<compile_context>
chip_gen: v6e
topology: v6e:2x2x1
jax: 0.10.0
libtpu: 0.0.40
codegen_flags: <defaults>
</compile_context>

<pallas_src>
import jax
import jax.numpy as jnp
from jax.experimental import pallas as pl
from jax.experimental.pallas import tpu as pltpu

VIT_HIDDEN = 768        # google/vit-base-patch16-224 hidden_size
AUDIO_HIDDEN = 768      # facebook/wav2vec2-base-960h hidden_size
NUM_CLASSES = 10
NUM_CLASSES_PADDED = 128   # lane-dense padded classifier width


# ---------------------------------------------------------------------------
# Pallas kernel: frame-mean + time-mean + concat (as split GEMM) + MLP
# ---------------------------------------------------------------------------
def fusion_kernel(x1_ref, x2_ref,
                  w1v_ref, w1a_ref, b1_ref,
                  w2_ref, b2_ref,
                  w3_ref, b3_ref,
                  w4_ref, b4_ref,
                  out_ref):
    """x1_ref: (TB, F, 768) f32   per-frame ViT pooler outputs
       x2_ref: (TB, S, 768) f32   Wav2Vec2 last_hidden_state
       w*_ref: bf16 weights (VMEM-resident across the batch grid)
       b*_ref: f32 biases
       out_ref:(TB, 128) f32      padded logits (first NUM_CLASSES valid)
    """
    inv_f = 1.0 / x1_ref.shape[1]          # static python floats
    inv_s = 1.0 / x2_ref.shape[1]

    # mean over frames / audio timesteps: XLU sublane reduce + VPU scale (f32)
    x1 = jnp.sum(x1_ref[...], axis=1) * inv_f        # (TB, 768)
    x2 = jnp.sum(x2_ref[...], axis=1) * inv_s        # (TB, 768)

    # concat(x1, x2) @ W1  ==  x1 @ W1_vit + x2 @ W1_aud   (no (TB,1536) concat)
    h = (jnp.dot(x1.astype(jnp.bfloat16), w1v_ref[...],
                 preferred_element_type=jnp.float32)
         + jnp.dot(x2.astype(jnp.bfloat16), w1a_ref[...],
                   preferred_element_type=jnp.float32)
         + b1_ref[...])
    h = jnp.maximum(h, 0.0)

    h = jnp.dot(h.astype(jnp.bfloat16), w2_ref[...],
                preferred_element_type=jnp.float32) + b2_ref[...]
    h = jnp.maximum(h, 0.0)

    h = jnp.dot(h.astype(jnp.bfloat16), w3_ref[...],
                preferred_element_type=jnp.float32) + b3_ref[...]
    h = jnp.maximum(h, 0.0)

    out_ref[...] = (jnp.dot(h.astype(jnp.bfloat16), w4_ref[...],
                            preferred_element_type=jnp.float32)
                    + b4_ref[...])


def _pick_batch_tile(B, F, S, input_budget_bytes=20 * 1024 * 1024):
    """Largest batch tile (multiple of 8, dividing B) whose double-buffered
    f32 input DMA fits the VMEM budget.  Falls back to the whole batch for
    tiny B (block == full dim satisfies the (8,128) rule)."""
    per_row = (F + S) * VIT_HIDDEN * 4 * 2      # f32, x2 for double buffering
    cap = max(1, input_budget_bytes // per_row)
    for tb in (256, 128, 64, 32, 16, 8):
        if tb <= cap and B % tb == 0:
            return tb
    return B


def fusion_classifier(x1_feats, x2_feats, params):
    """x1_feats: (B, F, 768) f32, x2_feats: (B, S, 768) f32 -> (B, NUM_CLASSES)."""
    B, F, _ = x1_feats.shape
    S = x2_feats.shape[1]
    (w1v, w1a, b1, w2, b2, w3, b3, w4, b4) = params
    n_pad = w4.shape[1]                         # 128 (lane-dense padded width)

    TB = _pick_batch_tile(B, F, S)
    grid = (B // TB,)

    feat1_spec = pl.BlockSpec((TB, F, VIT_HIDDEN), lambda b: (b, 0, 0))
    feat2_spec = pl.BlockSpec((TB, S, AUDIO_HIDDEN), lambda b: (b, 0, 0))
    # constant index_map -> DMA'd once, VMEM-resident across all grid steps
    const2d = lambda arr: pl.BlockSpec(arr.shape, lambda b: (0, 0))
    out_spec = pl.BlockSpec((TB, n_pad), lambda b: (b, 0))

    out = pl.pallas_call(
        fusion_kernel,
        out_shape=jax.ShapeDtypeStruct((B, n_pad), jnp.float32),
        grid_spec=pltpu.PrefetchScalarGridSpec(
            num_scalar_prefetch=0,
            grid=grid,
            in_specs=[feat1_spec, feat2_spec,
                      const2d(w1v), const2d(w1a), const2d(b1),
                      const2d(w2), const2d(b2),
                      const2d(w3), const2d(b3),
                      const2d(w4), const2d(b4)],
            out_specs=out_spec),
        compiler_params=pltpu.CompilerParams(
            dimension_semantics=("parallel",),      # megacore shard on v7x
            vmem_limit_bytes=32 * 1024 * 1024),
    )(x1_feats, x2_feats, w1v, w1a, b1, w2, b2, w3, b3, w4, b4)

    return out[:, :NUM_CLASSES]


# ---------------------------------------------------------------------------
# Deterministic parameter / stub-backbone setup (plain JAX glue)
# ---------------------------------------------------------------------------
def init_params(key):
    ks = jax.random.split(key, 8)

    def bf16(x):
        return x.astype(jnp.bfloat16)

    w1v = bf16(jax.random.normal(ks[0], (VIT_HIDDEN, 512), jnp.float32) * 0.02)
    w1a = bf16(jax.random.normal(ks[1], (AUDIO_HIDDEN, 512), jnp.float32) * 0.02)
    b1 = jnp.zeros((1, 512), jnp.float32)

    w2 = bf16(jax.random.normal(ks[2], (512, 256), jnp.float32) * 0.02)
    b2 = jnp.zeros((1, 256), jnp.float32)

    w3 = bf16(jax.random.normal(ks[3], (256, 64), jnp.float32) * 0.02)
    b3 = jnp.zeros((1, 64), jnp.float32)

    # final layer padded to 128 lanes; only the first NUM_CLASSES cols are real
    w4_logical = jax.random.normal(ks[4], (64, NUM_CLASSES), jnp.float32) * 0.02
    w4 = bf16(jnp.zeros((64, NUM_CLASSES_PADDED), jnp.float32)
              .at[:, :NUM_CLASSES].set(w4_logical))
    b4 = jnp.zeros((1, NUM_CLASSES_PADDED), jnp.float32)

    return (w1v, w1a, b1, w2, b2, w3, b3, w4, b4)


# TODO(synk): the pretrained ViT ('google/vit-base-patch16-224') and Wav2Vec2
# ('facebook/wav2vec2-base-960h') backbones have no clean in-script Pallas
# equivalent; they are replaced by deterministic linear feature projections.
def vit_stub(images, w_vit):
    # images: (B, F, C, H, W) NCHW frames -> pooler_output stand-in (B*F, 768)
    B, F, C, H, W = images.shape
    flat = images.reshape(B * F, C * H * W)
    return jnp.tanh(flat @ w_vit)            # ViT pooler applies tanh


def wav2vec2_stub(audio, w_aud, num_steps):
    # audio: (B, T) -> last_hidden_state stand-in (B, S, 768)
    B, T = audio.shape
    chunk = T // num_steps
    return audio.reshape(B, num_steps, chunk) @ w_aud


def fusion_model_forward(images, audio, params, w_vit, w_aud, num_steps):
    B, F, C, H, W = images.shape
    audio = audio.reshape(B, -1)
    x1 = vit_stub(images, w_vit)                  # (B*F, 768)
    x2 = wav2vec2_stub(audio, w_aud, num_steps)   # (B, S, 768)
    x1 = x1.reshape(B, F, VIT_HIDDEN)
    # frame-mean, time-mean, concat, and MLP classifier all happen in Pallas
    return fusion_classifier(x1, x2, params)


if __name__ == "__main__":
    key = jax.random.PRNGKey(0)
    k_img, k_aud, k_wv, k_wa, k_p = jax.random.split(key, 5)

    B, F, C, H, W = 2, 4, 3, 16, 16     # small spatial size in place of 224
    T = 800                              # raw audio samples
    S = 8                                # stand-in audio feature timesteps

    images = jax.random.normal(k_img, (B, F, C, H, W), jnp.float32)
    audio = jax.random.normal(k_aud, (B, T), jnp.float32)

    w_vit = jax.random.normal(k_wv, (C * H * W, VIT_HIDDEN), jnp.float32) * 0.02
    w_aud = jax.random.normal(k_wa, (T // S, AUDIO_HIDDEN), jnp.float32) * 0.02
    params = init_params(k_p)

    out = fusion_model_forward(images, audio, params, w_vit, w_aud, S)
    jax.block_until_ready(out)
    assert out.shape == (B, NUM_CLASSES) and out.dtype == jnp.float32
    print("KERNEL_OK")
</pallas_src>

<mosaic_0001>
module attributes {stable_mosaic.version = 11 : i64} {
  func.func @fusion_kernel(%arg0: i32, %arg1: memref<2x4x768xf32, #tpu.memory_space<vmem>>, %arg2: memref<2x8x768xf32, #tpu.memory_space<vmem>>, %arg3: memref<768x512xbf16, #tpu.memory_space<vmem>>, %arg4: memref<768x512xbf16, #tpu.memory_space<vmem>>, %arg5: memref<1x512xf32, #tpu.memory_space<vmem>>, %arg6: memref<512x256xbf16, #tpu.memory_space<vmem>>, %arg7: memref<1x256xf32, #tpu.memory_space<vmem>>, %arg8: memref<256x64xbf16, #tpu.memory_space<vmem>>, %arg9: memref<1x64xf32, #tpu.memory_space<vmem>>, %arg10: memref<64x128xbf16, #tpu.memory_space<vmem>>, %arg11: memref<1x128xf32, #tpu.memory_space<vmem>>, %arg12: memref<2x128xf32, #tpu.memory_space<vmem>>) attributes {dimension_semantics = [#tpu.dimension_semantics<parallel>], iteration_bounds = array<i64: 1>, scalar_prefetch = 0 : i64, scratch_operands = 0 : i64, tpu.core_type = #tpu.core_type<tc>, window_params = [{transform_indices = @transform_0, window_bounds = array<i64: 2, 4, 768>}, {transform_indices = @transform_1, window_bounds = array<i64: 2, 8, 768>}, {pipeline_mode = #tpu.pipeline_mode<synchronous>, transform_indices = @transform_2, window_bounds = array<i64: 768, 512>}, {pipeline_mode = #tpu.pipeline_mode<synchronous>, transform_indices = @transform_3, window_bounds = array<i64: 768, 512>}, {pipeline_mode = #tpu.pipeline_mode<synchronous>, transform_indices = @transform_4, window_bounds = array<i64: 1, 512>}, {pipeline_mode = #tpu.pipeline_mode<synchronous>, transform_indices = @transform_5, window_bounds = array<i64: 512, 256>}, {pipeline_mode = #tpu.pipeline_mode<synchronous>, transform_indices = @transform_6, window_bounds = array<i64: 1, 256>}, {pipeline_mode = #tpu.pipeline_mode<synchronous>, transform_indices = @transform_7, window_bounds = array<i64: 256, 64>}, {pipeline_mode = #tpu.pipeline_mode<synchronous>, transform_indices = @transform_8, window_bounds = array<i64: 1, 64>}, {pipeline_mode = #tpu.pipeline_mode<synchronous>, transform_indices = @transform_9, window_bounds = array<i64: 64, 128>}, {pipeline_mode = #tpu.pipeline_mode<synchronous>, transform_indices = @transform_10, window_bounds = array<i64: 1, 128>}, {transform_indices = @transform_11, window_bounds = array<i64: 2, 128>}]} {
    %c0 = arith.constant 0 : index
    %c0_0 = arith.constant 0 : index
    %c0_1 = arith.constant 0 : index
    %0 = vector.load %arg1[%c0, %c0_0, %c0_1] : memref<2x4x768xf32, #tpu.memory_space<vmem>>, vector<2x4x768xf32>
    %cst = arith.constant dense<0.000000e+00> : vector<2x768xf32>
    %1 = vector.multi_reduction <add>, %0, %cst [1] : vector<2x4x768xf32> to vector<2x768xf32>
    %cst_2 = arith.constant 2.500000e-01 : f32
    %2 = vector.broadcast %cst_2 : f32 to vector<2x768xf32>
    %3 = arith.mulf %1, %2 : vector<2x768xf32>
    %c0_3 = arith.constant 0 : index
    %c0_4 = arith.constant 0 : index
    %c0_5 = arith.constant 0 : index
    %4 = vector.load %arg2[%c0_3, %c0_4, %c0_5] : memref<2x8x768xf32, #tpu.memory_space<vmem>>, vector<2x8x768xf32>
    %cst_6 = arith.constant dense<0.000000e+00> : vector<2x768xf32>
    %5 = vector.multi_reduction <add>, %4, %cst_6 [1] : vector<2x8x768xf32> to vector<2x768xf32>
    %cst_7 = arith.constant 1.250000e-01 : f32
    %6 = vector.broadcast %cst_7 : f32 to vector<2x768xf32>
    %7 = arith.mulf %5, %6 : vector<2x768xf32>
    %8 = arith.truncf %3 : vector<2x768xf32> to vector<2x768xbf16>
    %c0_8 = arith.constant 0 : index
    %c0_9 = arith.constant 0 : index
    %9 = vector.load %arg3[%c0_8, %c0_9] : memref<768x512xbf16, #tpu.memory_space<vmem>>, vector<768x512xbf16>
    %cst_10 = arith.constant dense<0.000000e+00> : vector<2x512xf32>
    %10 = tpu.matmul %8, %9, %cst_10 {dimension_numbers = #tpu.dot_dimension_numbers<[1], [0], [0], [1], [0, 0, 1, 1], [], []>} : vector<2x768xbf16>, vector<768x512xbf16>, vector<2x512xf32> -> vector<2x512xf32>
    %11 = arith.truncf %7 : vector<2x768xf32> to vector<2x768xbf16>
    %c0_11 = arith.constant 0 : index
    %c0_12 = arith.constant 0 : index
    %12 = vector.load %arg4[%c0_11, %c0_12] : memref<768x512xbf16, #tpu.memory_space<vmem>>, vector<768x512xbf16>
    %cst_13 = arith.constant dense<0.000000e+00> : vector<2x512xf32>
    %13 = tpu.matmul %11, %12, %cst_13 {dimension_numbers = #tpu.dot_dimension_numbers<[1], [0], [0], [1], [0, 0, 1, 1], [], []>} : vector<2x768xbf16>, vector<768x512xbf16>, vector<2x512xf32> -> vector<2x512xf32>
    %14 = arith.addf %10, %13 : vector<2x512xf32>
    %c0_14 = arith.constant 0 : index
    %c0_15 = arith.constant 0 : index
    %15 = vector.load %arg5[%c0_14, %c0_15] : memref<1x512xf32, #tpu.memory_space<vmem>>, vector<1x512xf32>
    %16 = vector.broadcast %15 : vector<1x512xf32> to vector<2x512xf32>
    %17 = arith.addf %14, %16 : vector<2x512xf32>
    %cst_16 = arith.constant 0.000000e+00 : f32
    %18 = vector.broadcast %cst_16 : f32 to vector<2x512xf32>
    %19 = arith.maximumf %17, %18 : vector<2x512xf32>
    %20 = arith.truncf %19 : vector<2x512xf32> to vector<2x512xbf16>
    %c0_17 = arith.constant 0 : index
    %c0_18 = arith.constant 0 : index
    %21 = vector.load %arg6[%c0_17, %c0_18] : memref<512x256xbf16, #tpu.memory_space<vmem>>, vector<512x256xbf16>
    %cst_19 = arith.constant dense<0.000000e+00> : vector<2x256xf32>
    %22 = tpu.matmul %20, %21, %cst_19 {dimension_numbers = #tpu.dot_dimension_numbers<[1], [0], [0], [1], [0, 0, 1, 1], [], []>} : vector<2x512xbf16>, vector<512x256xbf16>, vector<2x256xf32> -> vector<2x256xf32>
    %c0_20 = arith.constant 0 : index
    %c0_21 = arith.constant 0 : index
    %23 = vector.load %arg7[%c0_20, %c0_21] : memref<1x256xf32, #tpu.memory_space<vmem>>, vector<1x256xf32>
    %24 = vector.broadcast %23 : vector<1x256xf32> to vector<2x256xf32>
    %25 = arith.addf %22, %24 : vector<2x256xf32>
    %cst_22 = arith.constant 0.000000e+00 : f32
    %26 = vector.broadcast %cst_22 : f32 to vector<2x256xf32>
    %27 = arith.maximumf %25, %26 : vector<2x256xf32>
    %28 = arith.truncf %27 : vector<2x256xf32> to vector<2x256xbf16>
    %c0_23 = arith.constant 0 : index
    %c0_24 = arith.constant 0 : index
    %29 = vector.load %arg8[%c0_23, %c0_24] : memref<256x64xbf16, #tpu.memory_space<vmem>>, vector<256x64xbf16>
    %cst_25 = arith.constant dense<0.000000e+00> : vector<2x64xf32>
    %30 = tpu.matmul %28, %29, %cst_25 {dimension_numbers = #tpu.dot_dimension_numbers<[1], [0], [0], [1], [0, 0, 1, 1], [], []>} : vector<2x256xbf16>, vector<256x64xbf16>, vector<2x64xf32> -> vector<2x64xf32>
    %c0_26 = arith.constant 0 : index
    %c0_27 = arith.constant 0 : index
    %31 = vector.load %arg9[%c0_26, %c0_27] : memref<1x64xf32, #tpu.memory_space<vmem>>, vector<1x64xf32>
    %32 = vector.broadcast %31 : vector<1x64xf32> to vector<2x64xf32>
    %33 = arith.addf %30, %32 : vector<2x64xf32>
    %cst_28 = arith.constant 0.000000e+00 : f32
    %34 = vector.broadcast %cst_28 : f32 to vector<2x64xf32>
    %35 = arith.maximumf %33, %34 : vector<2x64xf32>
    %36 = arith.truncf %35 : vector<2x64xf32> to vector<2x64xbf16>
    %c0_29 = arith.constant 0 : index
    %c0_30 = arith.constant 0 : index
    %37 = vector.load %arg10[%c0_29, %c0_30] : memref<64x128xbf16, #tpu.memory_space<vmem>>, vector<64x128xbf16>
    %cst_31 = arith.constant dense<0.000000e+00> : vector<2x128xf32>
    %38 = tpu.matmul %36, %37, %cst_31 {dimension_numbers = #tpu.dot_dimension_numbers<[1], [0], [0], [1], [0, 0, 1, 1], [], []>} : vector<2x64xbf16>, vector<64x128xbf16>, vector<2x128xf32> -> vector<2x128xf32>
    %c0_32 = arith.constant 0 : index
    %c0_33 = arith.constant 0 : index
    %39 = vector.load %arg11[%c0_32, %c0_33] : memref<1x128xf32, #tpu.memory_space<vmem>>, vector<1x128xf32>
    %40 = vector.broadcast %39 : vector<1x128xf32> to vector<2x128xf32>
    %41 = arith.addf %38, %40 : vector<2x128xf32>
    %c0_34 = arith.constant 0 : index
    %c0_35 = arith.constant 0 : index
    %42 = vector.load %arg12[%c0_34, %c0_35] : memref<2x128xf32, #tpu.memory_space<vmem>>, vector<2x128xf32>
    tpu.vector_store %arg12[%c0_34, %c0_35], %41 {strides = array<i32>} : memref<2x128xf32, #tpu.memory_space<vmem>>, vector<2x128xf32>,
    return
  }
  func.func @transform_0(%arg0: i32) -> (i32, i32, i32) {
    %c0_i32 = arith.constant 0 : i32
    %c0_i32_0 = arith.constant 0 : i32
    %c0_i32_1 = arith.constant 0 : i32
    return %arg0, %c0_i32, %c0_i32_0 : i32, i32, i32
  }
  func.func @transform_1(%arg0: i32) -> (i32, i32, i32) {
    %c0_i32 = arith.constant 0 : i32
    %c0_i32_0 = arith.constant 0 : i32
    %c0_i32_1 = arith.constant 0 : i32
    return %arg0, %c0_i32, %c0_i32_0 : i32, i32, i32
  }
  func.func @transform_2(%arg0: i32) -> (i32, i32) {
    %c0_i32 = arith.constant 0 : i32
    %c0_i32_0 = arith.constant 0 : i32
    %c0_i32_1 = arith.constant 0 : i32
    return %c0_i32, %c0_i32_0 : i32, i32
  }
  func.func @transform_3(%arg0: i32) -> (i32, i32) {
    %c0_i32 = arith.constant 0 : i32
    %c0_i32_0 = arith.constant 0 : i32
    %c0_i32_1 = arith.constant 0 : i32
    return %c0_i32, %c0_i32_0 : i32, i32
  }
  func.func @transform_4(%arg0: i32) -> (i32, i32) {
    %c0_i32 = arith.constant 0 : i32
    %c0_i32_0 = arith.constant 0 : i32
    %c0_i32_1 = arith.constant 0 : i32
    return %c0_i32, %c0_i32_0 : i32, i32
  }
  func.func @transform_5(%arg0: i32) -> (i32, i32) {
    %c0_i32 = arith.constant 0 : i32
    %c0_i32_0 = arith.constant 0 : i32
    %c0_i32_1 = arith.constant 0 : i32
    return %c0_i32, %c0_i32_0 : i32, i32
  }
  func.func @transform_6(%arg0: i32) -> (i32, i32) {
    %c0_i32 = arith.constant 0 : i32
    %c0_i32_0 = arith.constant 0 : i32
    %c0_i32_1 = arith.constant 0 : i32
    return %c0_i32, %c0_i32_0 : i32, i32
  }
  func.func @transform_7(%arg0: i32) -> (i32, i32) {
    %c0_i32 = arith.constant 0 : i32
    %c0_i32_0 = arith.constant 0 : i32
    %c0_i32_1 = arith.constant 0 : i32
    return %c0_i32, %c0_i32_0 : i32, i32
  }
  func.func @transform_8(%arg0: i32) -> (i32, i32) {
    %c0_i32 = arith.constant 0 : i32
    %c0_i32_0 = arith.constant 0 : i32
    %c0_i32_1 = arith.constant 0 : i32
    return %c0_i32, %c0_i32_0 : i32, i32
  }
  func.func @transform_9(%arg0: i32) -> (i32, i32) {
    %c0_i32 = arith.constant 0 : i32
    %c0_i32_0 = arith.constant 0 : i32
    %c0_i32_1 = arith.constant 0 : i32
    return %c0_i32, %c0_i32_0 : i32, i32
  }
  func.func @transform_10(%arg0: i32) -> (i32, i32) {
    %c0_i32 = arith.constant 0 : i32
    %c0_i32_0 = arith.constant 0 : i32
    %c0_i32_1 = arith.constant 0 : i32
    return %c0_i32, %c0_i32_0 : i32, i32
  }
  func.func @transform_11(%arg0: i32) -> (i32, i32) {
    %c0_i32 = arith.constant 0 : i32
    %c0_i32_0 = arith.constant 0 : i32
    return %arg0, %c0_i32 : i32, i32
  }
}

</mosaic_0001>

<bundles_post_ra>
// kernel: tpu_custom_call.1
= control target key start
LH: loop header
LB: loop body
LE: loop exit
PB: predicated region body
PF: predicated region fallthrough
CT: control target
= control target key end

     0   :  { %16 = vsyncpa [#allocation3], 0  ;;  %s5640_s0 = inlined_call_operand.vmem [shape: f32[2,4,768], index: 0, kind: input, shape index: {}]   ;;  %s5641_s1 = inlined_call_operand.vmem [shape: f32[2,8,768], index: 1, kind: input, shape index: {}]   ;;  %s5642_s2 = inlined_call_operand.hbm [shape: bf16[768,512], index: 2, kind: input, shape index: {}]   ;;  %s5643_s3 = inlined_call_operand.hbm [shape: bf16[768,512], index: 3, kind: input, shape index: {}]   ;;  %s5644_s4 = inlined_call_operand.vmem [shape: f32[1,512], index: 4, kind: input, shape index: {}]   ;;  %s5645_s5 = inlined_call_operand.hbm [shape: bf16[512,256], index: 5, kind: input, shape index: {}]   ;;  %s5646_s6 = inlined_call_operand.vmem [shape: f32[1,256], index: 6, kind: input, shape index: {}]   ;;  %s5647_s7 = inlined_call_operand.vmem [shape: bf16[256,64], index: 7, kind: input, shape index: {}]   ;;  %s5648_s8 = inlined_call_operand.vmem [shape: f32[1,64], index: 8, kind: input, shape index: {}]   ;;  %s5649_s9 = inlined_call_operand.vmem [shape: bf16[64,128], index: 9, kind: input, shape index: {}]   ;;  %s5650_s10 = inlined_call_operand.vmem [shape: f32[1,128], index: 10, kind: input, shape index: {}]   ;;  %s5651_s11 = inlined_call_operand.hbm [shape: f32[2,128], index: 11, kind: output, shape index: {}]  }
   0x1   :  { %17 = vsyncpa [#allocation6], 0 }
   0x2   :  { %18 = vsyncpa [#allocation4], 0  ;;  %s5300_s17 = smov [#allocation5]   ;;  %s5301_s19 = smov [#allocation2]  }
   0x3   :  { %s40_s18 = sshll.u32 %s5300_s17, 4  ;;  %s28_s20 = sshll.u32 %s5301_s19, 4  ;;  %s41_s18 = int_to_ptr.vmem [resolvable:$true] %s40_s18  ;;  %s29_s20 = int_to_ptr.vmem [resolvable:$true] %s28_s20 }
   0x4   :  { %s5222_s21 = scalar_lea.vmem %s41_s18, 24576  ;;  %p5227_p1 = scmp.lt.s32.totalorder %s41_s18, %s41_s18 }
   0x5   :  { %p5223_p0 = scmp.ne.s32.totalorder %s41_s18, %s5222_s21  ;;  %p5228_p2 = scmp.lt.s32.totalorder %s5222_s21, %s5222_s21 }
   0x7   :  { %p5229_p3 = por %p5228_p2, %p5227_p1 }
   0x9   :  { %p5230_p4 = pnand %p5229_p3, %p5223_p0 }
   0xb   :  { %5233 = shalt.err (!%p5230_p4)
}
   0xc   :  { %s5302_s22 = smov 256   ;;  %s5303_s23 = smov 16  }
   0xd   :  { %46 = dma.hbm_to_vmem [thread:$0]  %s5643_s3, 24576, %s41_s18, [#allocation6], %s5302_s22, %s5302_s22, %s5303_s23  }
   0xe   :  { %s5242_s26 = scalar_lea.vmem %s29_s20, 24576  ;;  %p5247_p6 = scmp.lt.s32.totalorder %s29_s20, %s29_s20 }
   0xf   :  { %p5243_p5 = scmp.ne.s32.totalorder %s29_s20, %s5242_s26  ;;  %p5248_p7 = scmp.lt.s32.totalorder %s5242_s26, %s5242_s26 }
  0x11   :  { %p5249_p8 = por %p5248_p7, %p5247_p6 }
  0x13   :  { %p5250_p9 = pnand %p5249_p8, %p5243_p5 }
  0x15   :  { %5253 = shalt.err (!%p5250_p9)
}
  0x16   :  { %34 = dma.hbm_to_vmem [thread:$0]  %s5642_s2, 24576, %s29_s20, [#allocation3], %s5302_s22, %s5302_s22, %s5303_s23  }
  0x17   :  { %s5304_s29 = smov [#allocation7]  }
  0x18   :  { %s54_s30 = sshll.u32 %s5304_s29, 4  ;;  %s55_s30 = int_to_ptr.vmem [resolvable:$true] %s54_s30 }
  0x19   :  { %s5262_s12 = scalar_lea.vmem %s55_s30, 8192  ;;  %p5267_p11 = scmp.lt.s32.totalorder %s55_s30, %s55_s30 }
  0x1a   :  { %p5263_p10 = scmp.ne.s32.totalorder %s55_s30, %s5262_s12  ;;  %p5268_p12 = scmp.lt.s32.totalorder %s5262_s12, %s5262_s12 }
  0x1c   :  { %p5269_p13 = por %p5268_p12, %p5267_p11 }
  0x1e   :  { %p5270_p0 = pnand %p5269_p13, %p5263_p10 }
  0x20   :  { %5273 = shalt.err (!%p5270_p0)
}
  0x21   :  { %s5305_s3 = smov 128   ;;  %s5306_s13 = smov 8  }
  0x22   :  { %60 = dma.hbm_to_vmem [thread:$0]  %s5645_s5, 8192, %s55_s30, [#allocation6], %s5305_s3, %s5305_s3, %s5306_s13  }
  0x23   :  { %5294 = dma.done.wait [#allocation3], 24576  }
  0x24   :  { %5295 = vsyncadd [#allocation3], 4294942720 }
  0x25   :  { %5296 = dma.done.wait [#allocation6], 32768  }
  0x26   :  { %5297 = vsyncadd [#allocation6], 4294934528  ;;  %v4516_v0 = vld [vmem:[#allocation5 + $0xe4] ss:$16 sps:$4 sm:$0xff]   ;;  %v4520_v2 = vld [vmem:[#allocation5 + $0xe0] ss:$16 sps:$4 sm:$0xff]  }
  0x27   :  { %v4518_v1 = vld [vmem:[#allocation5 + $0x2e4] ss:$16 sps:$4 sm:$0xff]   ;;  %1709 = vmatprep.subr.bf16.mxu0 %v4516_v0  ;;  %v4521_v3 = vld [vmem:[#allocation5 + $0x2e0] ss:$16 sps:$4 sm:$0xff]   ;;  %v203_v48 = vld [vmem:[%s5641_s1 + $0x8] sm:$0xff]  ;;  %vm730_vm0 = vcmask 1041409  }
  0x28   :  { %1750 = vmatprep.subr.bf16.mxu1 %v4518_v1  ;;  %v4522_v4 = vld [vmem:[#allocation5 + $0xc4] ss:$16 sps:$4 sm:$0xff]   ;;  %1710 = vmatpush1.bf16.msra.mxu0 %v4520_v2  ;;  %v4526_v6 = vld [vmem:[#allocation5 + $0xc0] ss:$16 sps:$4 sm:$0xff]   ;;  %v209_v51 = vld [vmem:[%s5641_s1 + $0x38] sm:$0xff]  ;;  %v220_v52 = vrot.slane %v203_v48, 4 }
  0x29   :  { %1751 = vmatpush1.bf16.msra.mxu1 %v4521_v3  ;;  %v4524_v5 = vld [vmem:[#allocation5 + $0x2c4] ss:$16 sps:$4 sm:$0xff]   ;;  %1711 = vmatprep.subr.bf16.mxu0 %v4522_v4  ;;  %v4527_v7 = vld [vmem:[#allocation5 + $0x2c0] ss:$16 sps:$4 sm:$0xff]   ;;  %v205_v53 = vld [vmem:[%s5641_s1 + $0x18] sm:$0xff]  ;;  %v256_v55 = vrot.slane %v209_v51, 4 }
  0x2a   :  { %1752 = vmatprep.subr.bf16.mxu1 %v4524_v5  ;;  %v4528_v8 = vld [vmem:[#allocation5 + $0xa4] ss:$16 sps:$4 sm:$0xff]   ;;  %v4532_v10 = vld [vmem:[#allocation5 + $0xa0] ss:$16 sps:$4 sm:$0xff]   ;;  %v211_v54 = vld [vmem:[%s5641_s1 + $0x48] sm:$0xff]  ;;  %v232_v56 = vrot.slane %v205_v53, 4  ;;  %v221_v61 = vadd.f32 %v220_v52, %v203_v48 }
  0x2b   :  { %v4530_v9 = vld [vmem:[#allocation5 + $0x2a4] ss:$16 sps:$4 sm:$0xff]   ;;  %v4533_v11 = vld [vmem:[#allocation5 + $0x2a0] ss:$16 sps:$4 sm:$0xff]   ;;  %v268_v57 = vrot.slane %v211_v54, 4  ;;  %v257_v3 = vadd.f32 %v256_v55, %v209_v51  ;;  %vm105_vm1 = vcmask 1043456  }
  0x2c   :  { %1712 = vmatpush1.bf16.msra.mxu0 %v4526_v6  ;;  %v4534_v12 = vld [vmem:[#allocation5 + $0x84] ss:$16 sps:$4 sm:$0xff]   ;;  %v4538_v14 = vld [vmem:[#allocation5 + $0x80] ss:$16 sps:$4 sm:$0xff]   ;;  %v233_v4 = vadd.f32 %v232_v56, %v205_v53  ;;  %vm5308_vm2 = vmmov 0   ;;  %vm3935_vm3 = vcmask 523264  }
  0x2d   :  { %1753 = vmatpush1.bf16.msra.mxu1 %v4527_v7  ;;  %1713 = vmatprep.subr.bf16.mxu0 %v4528_v8  ;;  %v4536_v13 = vld [vmem:[#allocation5 + $0x284] ss:$16 sps:$4 sm:$0xff]   ;;  %v4539_v15 = vld [vmem:[#allocation5 + $0x280] ss:$16 sps:$4 sm:$0xff]   ;;  %v269_v5 = vadd.f32 %v268_v57, %v211_v54 }
  0x2e   :  { %1754 = vmatprep.subr.bf16.mxu1 %v4530_v9  ;;  %v4540_v16 = vld [vmem:[#allocation5 + $0x64] ss:$16 sps:$4 sm:$0xff]   ;;  %v4544_v18 = vld [vmem:[#allocation5 + $0x60] ss:$16 sps:$4 sm:$0xff]   ;;  %v222_v9 = vrot.slane %v221_v61, 2 }
  0x2f   :  { %v4542_v17 = vld [vmem:[#allocation5 + $0x264] ss:$16 sps:$4 sm:$0xff]   ;;  %v4545_v19 = vld [vmem:[#allocation5 + $0x260] ss:$16 sps:$4 sm:$0xff]  }
  0x30   :  { %1714 = vmatpush1.bf16.msra.mxu0 %v4532_v10  ;;  %v4546_v20 = vld [vmem:[#allocation5 + $0x44] ss:$16 sps:$4 sm:$0xff]   ;;  %v4550_v22 = vld [vmem:[#allocation5 + $0x40] ss:$16 sps:$4 sm:$0xff]  }
  0x31   :  { %1755 = vmatpush1.bf16.msra.mxu1 %v4533_v11  ;;  %1715 = vmatprep.subr.bf16.mxu0 %v4534_v12  ;;  %v4548_v21 = vld [vmem:[#allocation5 + $0x244] ss:$16 sps:$4 sm:$0xff]   ;;  %v4551_v23 = vld [vmem:[#allocation5 + $0x240] ss:$16 sps:$4 sm:$0xff]  }
  0x32   :  { %1756 = vmatprep.subr.bf16.mxu1 %v4536_v13  ;;  %v4552_v24 = vld [vmem:[#allocation5 + $0x24] ss:$16 sps:$4 sm:$0xff]   ;;  %v4556_v26 = vld [vmem:[#allocation5 + $0x20] ss:$16 sps:$4 sm:$0xff]   ;;  %v258_v13 = vrot.slane %v257_v3, 2 }
  0x33   :  { %v4554_v25 = vld [vmem:[#allocation5 + $0x224] ss:$16 sps:$4 sm:$0xff]   ;;  %v4557_v27 = vld [vmem:[#allocation5 + $0x220] ss:$16 sps:$4 sm:$0xff]  }
  0x34   :  { %1716 = vmatpush1.bf16.msra.mxu0 %v4538_v14  ;;  %v4558_v28 = vld [vmem:[#allocation5 + $0x4] ss:$16 sps:$4 sm:$0xff]   ;;  %v4562_v30 = vld [vmem:[#allocation5] ss:$16 sps:$4 sm:$0xff]   ;;  %v234_v14 = vrot.slane %v233_v4, 2 }
  0x35   :  { %1757 = vmatpush1.bf16.msra.mxu1 %v4539_v15  ;;  %1717 = vmatprep.subr.bf16.mxu0 %v4540_v16  ;;  %v4560_v29 = vld [vmem:[#allocation5 + $0x204] ss:$16 sps:$4 sm:$0xff]   ;;  %v4563_v31 = vld [vmem:[#allocation5 + $0x200] ss:$16 sps:$4 sm:$0xff]   ;;  %v270_v15 = vrot.slane %v269_v5, 2 }
  0x36   :  { %1758 = vmatprep.subr.bf16.mxu1 %v4542_v17  ;;  %v4564_v32 = vld [vmem:[#allocation5 + $0x1e4] ss:$16 sps:$4 sm:$0xff]   ;;  %v4568_v34 = vld [vmem:[#allocation5 + $0x1e0] ss:$16 sps:$4 sm:$0xff]  }
  0x37   :  { %v4566_v33 = vld [vmem:[#allocation5 + $0x3e4] ss:$16 sps:$4 sm:$0xff]   ;;  %v4569_v35 = vld [vmem:[#allocation5 + $0x3e0] ss:$16 sps:$4 sm:$0xff]  }
  0x38   :  { %1718 = vmatpush1.bf16.msra.mxu0 %v4544_v18  ;;  %v4570_v36 = vld [vmem:[#allocation5 + $0x1c4] ss:$16 sps:$4 sm:$0xff]   ;;  %v4574_v38 = vld [vmem:[#allocation5 + $0x1c0] ss:$16 sps:$4 sm:$0xff]   ;;  %v223_v18 = vadd.f32 %v222_v9, %v221_v61 }
  0x39   :  { %1759 = vmatpush1.bf16.msra.mxu1 %v4545_v19  ;;  %1719 = vmatprep.subr.bf16.mxu0 %v4546_v20  ;;  %v4572_v37 = vld [vmem:[#allocation5 + $0x3c4] ss:$16 sps:$4 sm:$0xff]   ;;  %v4575_v39 = vld [vmem:[#allocation5 + $0x3c0] ss:$16 sps:$4 sm:$0xff]  }
  0x3a   :  { %1760 = vmatprep.subr.bf16.mxu1 %v4548_v21  ;;  %v4576_v40 = vld [vmem:[#allocation5 + $0x1a4] ss:$16 sps:$4 sm:$0xff]   ;;  %v4580_v42 = vld [vmem:[#allocation5 + $0x1a0] ss:$16 sps:$4 sm:$0xff]  }
  0x3b   :  { %v4578_v41 = vld [vmem:[#allocation5 + $0x3a4] ss:$16 sps:$4 sm:$0xff]   ;;  %v4581_v43 = vld [vmem:[#allocation5 + $0x3a0] ss:$16 sps:$4 sm:$0xff]  }
  0x3c   :  { %1720 = vmatpush1.bf16.msra.mxu0 %v4550_v22  ;;  %v4582_v44 = vld [vmem:[#allocation5 + $0x184] ss:$16 sps:$4 sm:$0xff]   ;;  %v4586_v46 = vld [vmem:[#allocation5 + $0x180] ss:$16 sps:$4 sm:$0xff]   ;;  %v259_v22 = vadd.f32 %v258_v13, %v257_v3 }
  0x3d   :  { %1761 = vmatpush1.bf16.msra.mxu1 %v4551_v23  ;;  %1721 = vmatprep.subr.bf16.mxu0 %v4552_v24  ;;  %v4584_v45 = vld [vmem:[#allocation5 + $0x384] ss:$16 sps:$4 sm:$0xff]   ;;  %v4587_v47 = vld [vmem:[#allocation5 + $0x380] ss:$16 sps:$4 sm:$0xff]   ;;  %v235_v23 = vadd.f32 %v234_v14, %v233_v4  ;;  %v271_v24 = vadd.f32 %v270_v15, %v269_v5 }
  0x3e   :  { %1762 = vmatprep.subr.bf16.mxu1 %v4554_v25  ;;  %v4588_v49 = vld [vmem:[#allocation5 + $0x164] ss:$16 sps:$4 sm:$0xff]   ;;  %v4592_v2 = vld [vmem:[#allocation5 + $0x160] ss:$16 sps:$4 sm:$0xff]  }
  0x3f   :  { %v4590_v50 = vld [vmem:[#allocation5 + $0x364] ss:$16 sps:$4 sm:$0xff]   ;;  %v4593_v7 = vld [vmem:[#allocation5 + $0x360] ss:$16 sps:$4 sm:$0xff]  }
  0x40   :  { %1722 = vmatpush1.bf16.msra.mxu0 %v4556_v26  ;;  %v202_v58 = vld [vmem:[%s5641_s1] sm:$0xff]  ;;  %v208_v59 = vld [vmem:[%s5641_s1 + $0x30] sm:$0xff] }
  0x41   :  { %1763 = vmatpush1.bf16.msra.mxu1 %v4557_v27  ;;  %1723 = vmatprep.subr.bf16.mxu0 %v4558_v28  ;;  %v204_v60 = vld [vmem:[%s5641_s1 + $0x10] sm:$0xff]  ;;  %v214_v62 = vrot.slane %v202_v58, 4  ;;  %v250_v63 = vrot.slane %v208_v59, 4  ;;  %v210_v0 = vld [vmem:[%s5641_s1 + $0x40] sm:$0xff]  ;;  %v224_v28 = vrot.slane %v223_v18, 1 }
  0x42   :  { %1764 = vmatprep.subr.bf16.mxu1 %v4560_v29  ;;  %v226_v1 = vrot.slane %v204_v60, 4  ;;  %v262_v6 = vrot.slane %v210_v0, 4  ;;  %v4594_v8 = vld [vmem:[#allocation5 + $0x144] ss:$16 sps:$4 sm:$0xff]   ;;  %v4598_v26 = vld [vmem:[#allocation5 + $0x140] ss:$16 sps:$4 sm:$0xff]  }
  0x43   :  { %v215_v10 = vadd.f32 %v214_v62, %v202_v58  ;;  %v251_v11 = vadd.f32 %v250_v63, %v208_v59  ;;  %v4596_v17 = vld [vmem:[#allocation5 + $0x344] ss:$16 sps:$4 sm:$0xff]   ;;  %v4599_v27 = vld [vmem:[#allocation5 + $0x340] ss:$16 sps:$4 sm:$0xff]  }
  0x44   :  { %1724 = vmatpush1.bf16.msra.mxu0 %v4562_v30  ;;  %v227_v12 = vadd.f32 %v226_v1, %v204_v60  ;;  %v263_v16 = vadd.f32 %v262_v6, %v210_v0  ;;  %v4606_v52 = vld [vmem:[#allocation5 + $0x104] ss:$16 sps:$4 sm:$0xff]  }
  0x45   :  { %1765 = vmatpush1.bf16.msra.mxu1 %v4563_v31  ;;  %1725 = vmatprep.subr.bf16.mxu0 %v4564_v32  ;;  %v216_v19 = vrot.slane %v215_v10, 2  ;;  %v252_v20 = vrot.slane %v251_v11, 2  ;;  %v4600_v32 = vld [vmem:[#allocation5 + $0x124] ss:$16 sps:$4 sm:$0xff]  }
  0x46   :  { %1766 = vmatprep.subr.bf16.mxu1 %v4566_v33  ;;  %v228_v21 = vrot.slane %v227_v12, 2  ;;  %v264_v25 = vrot.slane %v263_v16, 2  ;;  %v260_v33 = vrot.slane %v259_v22, 1  ;;  %v4608_v57 = vld [vmem:[#allocation5 + $0x304] ss:$16 sps:$4 sm:$0xff]  }
  0x47   :  { %v217_v29 = vadd.f32 %v216_v19, %v215_v10  ;;  %v253_v30 = vadd.f32 %v252_v20, %v251_v11  ;;  %v4617_v19 = vld [vmem:[#allocation5 + $0xec] ss:$16 sps:$4 sm:$0xff]  }
  0x48   :  { %1726 = vmatpush2.bf16.msra.mxu0 %v4568_v34  ;;  %v229_v31 = vadd.f32 %v228_v21, %v227_v12  ;;  %v236_v34 = vrot.slane %v235_v23, 1 }
  0x49   :  { %1767 = vmatpush2.bf16.msra.mxu1 %v4569_v35  ;;  %1727 = vmatprep.subr.bf16.mxu0 %v4570_v36  ;;  %v272_v35 = vrot.slane %v271_v24, 1  ;;  %v265_v36 = vadd.f32 %v264_v25, %v263_v16 }
  0x4a   :  { %1768 = vmatprep.subr.bf16.mxu1 %v4572_v37  ;;  %v4602_v37 = vld [vmem:[#allocation5 + $0x324] ss:$16 sps:$4 sm:$0xff]  }
  0x4c   :  { %1728 = vmatpush2.bf16.msra.mxu0 %v4574_v38  ;;  %v225_v38 = vadd.f32 %v224_v28, %v223_v18  ;;  %v4614_v18 = vld [vmem:[#allocation5 + $0x4e4] ss:$16 sps:$4 sm:$0xff]  }
  0x4d   :  { %1769 = vmatpush2.bf16.msra.mxu1 %v4575_v39  ;;  %1729 = vmatprep.subr.bf16.mxu0 %v4576_v40  ;;  %v218_v39 = vrot.slane %v217_v29, 1  ;;  %v254_v40 = vrot.slane %v253_v30, 1  ;;  %v4620_v28 = vld [vmem:[#allocation5 + $0x4c4] ss:$16 sps:$4 sm:$0xff]  }
  0x4e   :  { %1770 = vmatprep.subr.bf16.mxu1 %v4578_v41  ;;  %v230_v41 = vrot.slane %v229_v31, 1  ;;  %v287_v48 = vmul.f32 0.125, %v225_v38  ;;  %v4630_v38 = vld [vmem:[#allocation5 + $0x480] ss:$16 sps:$4 sm:$0xff]  }
  0x50   :  { %1730 = vmatpush2.bf16.msra.mxu0 %v4580_v42  ;;  %v261_v42 = vadd.f32 %v260_v33, %v259_v22  ;;  %v231_v51 = vadd.f32 %v230_v41, %v229_v31  ;;  %v503_v58 = vpack.c.bf16 %v287_v48, %v287_v48  ;;  %v4621_v31 = vld [vmem:[#allocation5 + $0xc8] ss:$16 sps:$4 sm:$0xff]   ;;  %v4629_v33 = vld [vmem:[#allocation5 + $0xac] ss:$16 sps:$4 sm:$0xff]   ;;  %v4650_v48 = vld [vmem:[#allocation5 + $0x424] ss:$16 sps:$4 sm:$0xff]  }
  0x51   :  { %1771 = vmatpush2.bf16.msra.mxu1 %v4581_v43  ;;  %1731 = vmatprep.subr.bf16.mxu0 %v4582_v44  ;;  %v237_v43 = vadd.f32 %v236_v34, %v235_v23  ;;  %v273_v44 = vadd.f32 %v272_v35, %v271_v24  ;;  %v4612_v23 = vld [vmem:[#allocation5 + $0x4e0] ss:$16 sps:$4 sm:$0xff]   ;;  %v4627_v35 = vld [vmem:[#allocation5 + $0xa8] ss:$16 sps:$4 sm:$0xff]   ;;  %v4641_v41 = vld [vmem:[#allocation5 + $0x6c] ss:$16 sps:$4 sm:$0xff]  }
  0x52   :  { %1772 = vmatprep.subr.bf16.mxu1 %v4584_v45  ;;  %v266_v45 = vrot.slane %v265_v36, 1  ;;  %v293_v53 = vmul.f32 0.125, %v261_v42  ;;  %v288_v61 = vmul.f32 0.125, %v231_v51  ;;  %v719_v3 = vunpack.c.l.b16 %v503_v58  ;;  %v4624_v34 = vld [vmem:[#allocation5 + $0x4a0] ss:$16 sps:$4 sm:$0xff]  }
  0x53   :  { %v289_v54 = vmul.f32 0.125, %v237_v43  ;;  %v295_v55 = vmul.f32 0.125, %v273_v44  ;;  %v4636_v42 = vld [vmem:[#allocation5 + $0x460] ss:$16 sps:$4 sm:$0xff]   ;;  %v4639_v43 = vld [vmem:[#allocation5 + $0x68] ss:$16 sps:$4 sm:$0xff]  }
  0x54   :  { %1732 = vmatpush2.bf16.msra.mxu0 %v4586_v46  ;;  %v4604_v46 = vld [vmem:[#allocation5 + $0x120] ss:$16 sps:$4 sm:$0xff]   ;;  %v267_v56 = vadd.f32 %v266_v45, %v265_v36  ;;  %v509_v62 = vpack.c.bf16 %v293_v53, %v293_v53  ;;  %v504_v6 = vpack.c.bf16 %v288_v61, %v288_v61  ;;  %v4632_v36 = vld [vmem:[#allocation5 + $0x484] ss:$16 sps:$4 sm:$0xff]   ;;  %v4647_v45 = vld [vmem:[#allocation5 + $0x4c] ss:$16 sps:$4 sm:$0xff]  }
  0x55   :  { %1773 = vmatpush2.bf16.msra.mxu1 %v4587_v47  ;;  %1733 = vmatprep.subr.bf16.mxu0 %v4588_v49  ;;  %v4605_v47 = vld [vmem:[#allocation5 + $0x320] ss:$16 sps:$4 sm:$0xff]   ;;  %v219_v49 = vadd.f32 %v218_v39, %v217_v29  ;;  %v505_v63 = vpack.c.bf16 %v289_v54, %v289_v54  ;;  %v511_v0 = vpack.c.bf16 %v295_v55, %v295_v55  ;;  %v4623_v29 = vld [vmem:[#allocation5 + $0xcc] ss:$16 sps:$4 sm:$0xff]   ;;  %v4633_v39 = vld [vmem:[#allocation5 + $0x88] ss:$16 sps:$4 sm:$0xff]  }
  0x56   :  { %1774 = vmatprep.subr.bf16.mxu1 %v4590_v50  ;;  %v255_v50 = vadd.f32 %v254_v40, %v253_v30  ;;  %v294_v1 = vmul.f32 0.125, %v267_v56  ;;  %v720_v14 = vunpack.c.l.b16 %v504_v6  ;;  %v4618_v30 = vld [vmem:[#allocation5 + $0x4c0] ss:$16 sps:$4 sm:$0xff]   ;;  %v4638_v40 = vld [vmem:[#allocation5 + $0x464] ss:$16 sps:$4 sm:$0xff]   ;;  %v207_v54 = vld [vmem:[%s5641_s1 + $0x28] sm:$0xff] }
  0x57   :  { %v286_v59 = vmul.f32 0.125, %v219_v49  ;;  %v721_v9 = vunpack.c.l.b16 %v505_v63  ;;  %v727_v10 = vunpack.c.l.b16 %v511_v0  ;;  %v4644_v44 = vld [vmem:[#allocation5 + $0x444] ss:$16 sps:$4 sm:$0xff]   ;;  %v4653_v49 = vld [vmem:[#allocation5 + $0x2c] ss:$16 sps:$4 sm:$0xff]   ;;  %v244_v56 = vrot.slane %v207_v54, 4 }
  0x58   :  { %1734 = vmatpush2.bf16.msra.mxu0 %v4592_v2  ;;  %v292_v60 = vmul.f32 0.125, %v255_v50  ;;  %v4610_v2 = vld [vmem:[#allocation5 + $0x100] ss:$16 sps:$4 sm:$0xff]   ;;  %v510_v11 = vpack.c.bf16 %v294_v1, %v294_v1  ;;  %v4651_v51 = vld [vmem:[#allocation5 + $0x28] ss:$16 sps:$4 sm:$0xff]  }
  0x59   :  { %1775 = vmatpush2.bf16.msra.mxu1 %v4593_v7  ;;  %1735 = vmatprep.subr.bf16.mxu0 %v4594_v8  ;;  %v502_v4 = vpack.c.bf16 %v286_v59, %v286_v59  ;;  %v4611_v7 = vld [vmem:[#allocation5 + $0x300] ss:$16 sps:$4 sm:$0xff]   ;;  %v725_v8 = vunpack.c.l.b16 %v509_v62  ;;  %v734_v16 = vsel %vm730_vm0, %v727_v10, %v721_v9  ;;  %v4659_v53 = vld [vmem:[#allocation5 + $0xc] ss:$16 sps:$4 sm:$0xff]   ;;  %v4657_v63 = vld [vmem:[#allocation5 + $0x8] ss:$16 sps:$4 sm:$0xff]   ;;  %v245_v0 = vadd.f32 %v244_v56, %v207_v54 }
  0x5a   :  { %1776 = vmatprep.subr.bf16.mxu1 %v4596_v17  ;;  %v508_v5 = vpack.c.bf16 %v292_v60, %v292_v60  ;;  %v726_v17 = vunpack.c.l.b16 %v510_v11  ;;  %v5405_v21 = vpack.c.b16 %v734_v16, %v734_v16  ;;  %v4648_v50 = vld [vmem:[#allocation5 + $0x420] ss:$16 sps:$4 sm:$0xff]   ;;  %v213_v55 = vld [vmem:[%s5641_s1 + $0x58] sm:$0xff]  ;;  %v4662_v1 = vld [vmem:[#allocation5 + $0x5e4] ss:$16 sps:$4 sm:$0xff]  }
  0x5b   :  { %v718_v12 = vunpack.c.l.b16 %v502_v4  ;;  %v732_v15 = vsel %vm730_vm0, %v725_v8, %v719_v3  ;;  %v212_v58 = vld [vmem:[%s5641_s1 + $0x50] sm:$0xff]  ;;  %v280_v59 = vrot.slane %v213_v55, 4  ;;  %v4663_v9 = vld [vmem:[#allocation5 + $0x1e8] ss:$16 sps:$4 sm:$0xff]   ;;  %v4695_v54 = vld [vmem:[#allocation5 + $0x14c] ss:$16 sps:$4 sm:$0xff]  }
  0x5c   :  { %1736 = vmatpush2.bf16.msra.mxu0 %v4598_v26  ;;  %v724_v13 = vunpack.c.l.b16 %v508_v5  ;;  %v738_v20 = vpack.c.b16 %v732_v15, %v732_v15  ;;  %v733_v25 = vsel %vm730_vm0, %v726_v17, %v720_v14  ;;  %v4615_v26 = vld [vmem:[#allocation5 + $0xe8] ss:$16 sps:$4 sm:$0xff]   ;;  %1782 = vmatprep.mubr.bf16.mxu1 %v5405_v21  ;;  %v274_v61 = vrot.slane %v212_v58, 4  ;;  %v4654_v62 = vld [vmem:[#allocation5 + $0x400] ss:$16 sps:$4 sm:$0xff]  }
  0x5d   :  { %1777 = vmatpush2.bf16.msra.mxu1 %v4599_v27  ;;  %1737 = vmatprep.subr.bf16.mxu0 %v4600_v32  ;;  %v5412_v27 = vpack.c.b16 %v733_v25, %v733_v25  ;;  %v4626_v32 = vld [vmem:[#allocation5 + $0x4a4] ss:$16 sps:$4 sm:$0xff]   ;;  %v281_v3 = vadd.f32 %v280_v59, %v213_v55  ;;  %v4660_v6 = vld [vmem:[#allocation5 + $0x5e0] ss:$16 sps:$4 sm:$0xff]   ;;  %v4671_v14 = vld [vmem:[#allocation5 + $0x1cc] ss:$16 sps:$4 sm:$0xff]  }
  0x5e   :  { %1778 = vmatprep.subr.bf16.mxu1 %v4602_v37  ;;  %v731_v22 = vsel %vm730_vm0, %v724_v13, %v718_v12  ;;  %1741 = vmatprep.mubr.bf16.mxu0 %v738_v20  ;;  %v4635_v37 = vld [vmem:[#allocation5 + $0x8c] ss:$16 sps:$4 sm:$0xff]   ;;  %v275_v5 = vadd.f32 %v274_v61, %v212_v58  ;;  %v4668_v13 = vld [vmem:[#allocation5 + $0x5c4] ss:$16 sps:$4 sm:$0xff]   ;;  %v4690_v55 = vld [vmem:[#allocation5 + $0x540] ss:$16 sps:$4 sm:$0xff]  }
  0x5f   :  { %v5408_v24 = vpack.c.b16 %v731_v22, %v731_v22  ;;  %v282_v8 = vrot.slane %v281_v3, 2  ;;  %v4674_v25 = vld [vmem:[#allocation5 + $0x5a4] ss:$16 sps:$4 sm:$0xff]   ;;  %v4693_v56 = vld [vmem:[#allocation5 + $0x148] ss:$16 sps:$4 sm:$0xff]  }
  0x60   :  { %1738 = vmatpush2.bf16.msra.mxu0 %v4604_v46  ;;  %v4642_v46 = vld [vmem:[#allocation5 + $0x440] ss:$16 sps:$4 sm:$0xff]   ;;  %v276_v12 = vrot.slane %v275_v5, 2  ;;  %v4698_v59 = vld [vmem:[#allocation5 + $0x524] ss:$16 sps:$4 sm:$0xff]  }
  0x61   :  { %1779 = vmatpush2.bf16.msra.mxu1 %v4605_v47  ;;  %1739 = vmatprep.subr.bf16.mxu0 %v4606_v52  ;;  %v4645_v47 = vld [vmem:[#allocation5 + $0x48] ss:$16 sps:$4 sm:$0xff]   ;;  %v4656_v52 = vld [vmem:[#allocation5 + $0x404] ss:$16 sps:$4 sm:$0xff]   ;;  %v283_v15 = vadd.f32 %v282_v8, %v281_v3  ;;  %v4696_v61 = vld [vmem:[#allocation5 + $0x520] ss:$16 sps:$4 sm:$0xff]  }
  0x62   :  { %1780 = vmatprep.subr.bf16.mxu1 %v4608_v57  ;;  %v206_v57 = vld [vmem:[%s5641_s1 + $0x20] sm:$0xff] }
  0x63   :  { %v238_v60 = vrot.slane %v206_v57, 4  ;;  %v284_v17 = vrot.slane %v283_v15, 1  ;;  %v4702_v3 = vld [vmem:[#allocation5 + $0x500] ss:$16 sps:$4 sm:$0xff]  }
  0x64   :  { %1740 = vmatpush2.bf16.msra.mxu0 %v4610_v2  ;;  %v4665_v2 = vld [vmem:[#allocation5 + $0x1ec] ss:$16 sps:$4 sm:$0xff]  }
  0x65   :  { %1781 = vmatpush2.bf16.msra.mxu1 %v4611_v7  ;;  %1791 = vmatprep.subr.bf16.mxu0 %v4614_v18  ;;  %v239_v4 = vadd.f32 %v238_v60, %v206_v57  ;;  %v246_v7 = vrot.slane %v245_v0, 2  ;;  %v4666_v18 = vld [vmem:[#allocation5 + $0x5c0] ss:$16 sps:$4 sm:$0xff]   ;;  %v4701_v60 = vld [vmem:[#allocation5 + $0x12c] ss:$16 sps:$4 sm:$0xff]  }
  0x66   :  { %1832 = vmatprep.subr.bf16.mxu1 %v4617_v19  ;;  %v4669_v19 = vld [vmem:[#allocation5 + $0x1c8] ss:$16 sps:$4 sm:$0xff]  }
  0x67   :  { %1742 = vmatmul.mubr.bf16.vlgmr.msra.gmra.mxu0 %v5408_v24  ;;  %v247_v10 = vadd.f32 %v246_v7, %v245_v0  ;;  %v240_v11 = vrot.slane %v239_v4, 2  ;;  %v4713_v7 = vld [vmem:[#allocation5 + $0x4ec] ss:$16 sps:$4 sm:$0xff]  }
  0x68   :  { %1783 = vmatmul.mubr.bf16.vlgmr.msra.gmra.mxu1 %v5412_v27  ;;  %1792 = vmatpush1.bf16.msra.mxu0 %v4612_v23  ;;  %v277_v23 = vadd.f32 %v276_v12, %v275_v5  ;;  %v4719_v12 = vld [vmem:[#allocation5 + $0x4cc] ss:$16 sps:$4 sm:$0xff]  }
  0x69   :  { %1833 = vmatpush1.bf16.msra.mxu1 %v4615_v26  ;;  %1793 = vmatprep.subr.bf16.mxu0 %v4620_v28  ;;  %v248_v16 = vrot.slane %v247_v10, 1  ;;  %v241_v22 = vadd.f32 %v240_v11, %v239_v4  ;;  %v4677_v26 = vld [vmem:[#allocation5 + $0x1ac] ss:$16 sps:$4 sm:$0xff]   ;;  %v285_v28 = vadd.f32 %v284_v17, %v283_v15  ;;  %v4705_v4 = vld [vmem:[#allocation5 + $0x108] ss:$16 sps:$4 sm:$0xff]  }
  0x6a   :  { %1834 = vmatprep.subr.bf16.mxu1 %v4623_v29  ;;  %1864 = vmatprep.mubr.bf16.mxu1 %v738_v20  ;;  %v4672_v29 = vld [vmem:[#allocation5 + $0x5a0] ss:$16 sps:$4 sm:$0xff]   ;;  %v4716_v11 = vld [vmem:[#allocation5 + $0x2cc] ss:$16 sps:$4 sm:$0xff]   ;;  %v4720_v17 = vld [vmem:[#allocation5 + $0x2a8] ss:$16 sps:$4 sm:$0xff]  }
  0x6b   :  { %v249_v20 = vadd.f32 %v248_v16, %v247_v10  ;;  %v4711_v10 = vld [vmem:[#allocation5 + $0x4e8] ss:$16 sps:$4 sm:$0xff]   ;;  %v4722_v15 = vld [vmem:[#allocation5 + $0x2ac] ss:$16 sps:$4 sm:$0xff]  }
  0x6c   :  { %1794 = vmatpush1.bf16.msra.mxu0 %v4618_v30  ;;  %v4725_v16 = vld [vmem:[#allocation5 + $0x4ac] ss:$16 sps:$4 sm:$0xff]  }
  0x6d   :  { %1835 = vmatpush1.bf16.msra.mxu1 %v4621_v31  ;;  %1795 = vmatprep.subr.bf16.mxu0 %v4626_v32  ;;  %v291_v30 = vmul.f32 0.125, %v249_v20  ;;  %v297_v31 = vmul.f32 0.125, %v285_v28  ;;  %v4675_v32 = vld [vmem:[#allocation5 + $0x1a8] ss:$16 sps:$4 sm:$0xff]   ;;  %v4731_v20 = vld [vmem:[#allocation5 + $0x48c] ss:$16 sps:$4 sm:$0xff]  }
  0x6e   :  { %1836 = vmatprep.subr.bf16.mxu1 %v4629_v33  ;;  %v4740_v28 = vld [vmem:[#allocation5 + $0x24c] ss:$16 sps:$4 sm:$0xff]  }
  0x6f   :  { %v507_v33 = vpack.c.bf16 %v291_v30, %v291_v30  ;;  %v4738_v30 = vld [vmem:[#allocation5 + $0x248] ss:$16 sps:$4 sm:$0xff]  }
  0x70   :  { %1796 = vmatpush1.bf16.msra.mxu0 %v4624_v34  ;;  %v242_v34 = vrot.slane %v241_v22, 1 }
  0x71   :  { %1837 = vmatpush1.bf16.msra.mxu1 %v4627_v35  ;;  %1797 = vmatprep.subr.bf16.mxu0 %v4632_v36  ;;  %v278_v35 = vrot.slane %v277_v23, 1  ;;  %v4680_v36 = vld [vmem:[#allocation5 + $0x584] ss:$16 sps:$4 sm:$0xff]  }
  0x72   :  { %1838 = vmatprep.subr.bf16.mxu1 %v4635_v37  ;;  %v4683_v37 = vld [vmem:[#allocation5 + $0x18c] ss:$16 sps:$4 sm:$0xff]  }
  0x74   :  { %1798 = vmatpush1.bf16.msra.mxu0 %v4630_v38  ;;  %v513_v38 = vpack.c.bf16 %v297_v31, %v297_v31  ;;  %v4741_v31 = vld [vmem:[#allocation5 + $0x448] ss:$16 sps:$4 sm:$0xff]  }
  0x75   :  { %1839 = vmatpush1.bf16.msra.mxu1 %v4633_v39  ;;  %1799 = vmatprep.subr.bf16.mxu0 %v4638_v40  ;;  %v723_v39 = vunpack.c.l.b16 %v507_v33  ;;  %v4678_v40 = vld [vmem:[#allocation5 + $0x580] ss:$16 sps:$4 sm:$0xff]   ;;  %v4749_v33 = vld [vmem:[#allocation5 + $0x42c] ss:$16 sps:$4 sm:$0xff]  }
  0x76   :  { %1840 = vmatprep.subr.bf16.mxu1 %v4641_v41  ;;  %v729_v41 = vunpack.c.l.b16 %v513_v38  ;;  %v4750_v38 = vld [vmem:[#allocation5 + $0x208] ss:$16 sps:$4 sm:$0xff]  }
  0x78   :  { %1800 = vmatpush1.bf16.msra.mxu0 %v4636_v42  ;;  %v4681_v42 = vld [vmem:[#allocation5 + $0x188] ss:$16 sps:$4 sm:$0xff]  }
  0x79   :  { %1841 = vmatpush1.bf16.msra.mxu1 %v4639_v43  ;;  %1801 = vmatprep.subr.bf16.mxu0 %v4644_v44  ;;  %v243_v43 = vadd.f32 %v242_v34, %v241_v22  ;;  %v279_v44 = vadd.f32 %v278_v35, %v277_v23  ;;  %v4729_v22 = vld [vmem:[#allocation5 + $0x488] ss:$16 sps:$4 sm:$0xff]   ;;  %v4734_v23 = vld [vmem:[#allocation5 + $0x26c] ss:$16 sps:$4 sm:$0xff]  }
  0x7a   :  { %1842 = vmatprep.subr.bf16.mxu1 %v4647_v45  ;;  %v4686_v45 = vld [vmem:[#allocation5 + $0x564] ss:$16 sps:$4 sm:$0xff]   ;;  %v4744_v34 = vld [vmem:[#allocation5 + $0x228] ss:$16 sps:$4 sm:$0xff]  }
  0x7b   :  { %v4747_v35 = vld [vmem:[#allocation5 + $0x428] ss:$16 sps:$4 sm:$0xff]  }
  0x7c   :  { %1802 = vmatpush1.bf16.msra.mxu0 %v4642_v46  ;;  %v4689_v46 = vld [vmem:[#allocation5 + $0x16c] ss:$16 sps:$4 sm:$0xff]  }
  0x7d   :  { %1843 = vmatpush1.bf16.msra.mxu1 %v4645_v47  ;;  %1803 = vmatprep.subr.bf16.mxu0 %v4650_v48  ;;  %v736_v47 = vsel %vm730_vm0, %v729_v41, %v723_v39  ;;  %v4753_v39 = vld [vmem:[#allocation5 + $0x408] ss:$16 sps:$4 sm:$0xff]   ;;  %v4761_v41 = vld [vmem:[#allocation5 + $0x5ec] ss:$16 sps:$4 sm:$0xff]  }
  0x7e   :  { %1844 = vmatprep.subr.bf16.mxu1 %v4653_v49  ;;  %v742_v48 = vpack.c.b16 %v736_v47, %v736_v47  ;;  %v4684_v49 = vld [vmem:[#allocation5 + $0x560] ss:$16 sps:$4 sm:$0xff]   ;;  %v4765_v47 = vld [vmem:[#allocation5 + $0x5c8] ss:$16 sps:$4 sm:$0xff]  }
  0x80   :  { %1804 = vmatpush1.bf16.msra.mxu0 %v4648_v50  ;;  %v4687_v50 = vld [vmem:[#allocation5 + $0x168] ss:$16 sps:$4 sm:$0xff]   ;;  %1823 = vmatprep.mubr.bf16.mxu0 %v742_v48 }
  0x81   :  { %1845 = vmatpush1.bf16.msra.mxu1 %v4651_v51  ;;  %1805 = vmatprep.subr.bf16.mxu0 %v4656_v52  ;;  %v290_v51 = vmul.f32 0.125, %v243_v43  ;;  %v296_v52 = vmul.f32 0.125, %v279_v44  ;;  %v4759_v43 = vld [vmem:[#allocation5 + $0x5e8] ss:$16 sps:$4 sm:$0xff]   ;;  %v4764_v44 = vld [vmem:[#allocation5 + $0x3cc] ss:$16 sps:$4 sm:$0xff]  }
  0x82   :  { %1846 = vmatprep.subr.bf16.mxu1 %v4659_v53  ;;  %v4692_v53 = vld [vmem:[#allocation5 + $0x544] ss:$16 sps:$4 sm:$0xff]  }
  0x83   :  { %v506_v57 = vpack.c.bf16 %v290_v51, %v290_v51  ;;  %v512_v58 = vpack.c.bf16 %v296_v52, %v296_v52  ;;  %v4771_v51 = vld [vmem:[#allocation5 + $0x5a8] ss:$16 sps:$4 sm:$0xff]   ;;  %v4776_v52 = vld [vmem:[#allocation5 + $0x38c] ss:$16 sps:$4 sm:$0xff]  }
  0x84   :  { %1806 = vmatpush1.bf16.msra.mxu0 %v4654_v62  ;;  %v4699_v62 = vld [vmem:[#allocation5 + $0x128] ss:$16 sps:$4 sm:$0xff]  }
  0x85   :  { %1847 = vmatpush1.bf16.msra.mxu1 %v4657_v63  ;;  %1807 = vmatprep.subr.bf16.mxu0 %v4662_v1  ;;  %v722_v63 = vunpack.c.l.b16 %v506_v57  ;;  %v728_v0 = vunpack.c.l.b16 %v512_v58  ;;  %v4704_v1 = vld [vmem:[#allocation5 + $0x504] ss:$16 sps:$4 sm:$0xff]   ;;  %v4785_v57 = vld [vmem:[#allocation5 + $0x56c] ss:$16 sps:$4 sm:$0xff]   ;;  %v4780_v58 = vld [vmem:[#allocation5 + $0x368] ss:$16 sps:$4 sm:$0xff]  }
  0x86   :  { %1848 = vmatprep.subr.bf16.mxu1 %v4665_v2  ;;  %v4707_v2 = vld [vmem:[#allocation5 + $0x10c] ss:$16 sps:$4 sm:$0xff]  }
  0x87   :  { %v735_v5 = vsel %vm730_vm0, %v728_v0, %v722_v63  ;;  %v5443_v63 = vld [vmem:[%s5640_s0 + $0x18] sm:$0xff] }
  0x88   :  { %1808 = vmatpush2.bf16.msra.mxu0 %v4660_v6  ;;  %v4710_v6 = vld [vmem:[#allocation5 + $0x2ec] ss:$16 sps:$4 sm:$0xff]   ;;  %v5430_v8 = vpack.c.b16 %v735_v5, %v735_v5 }
  0x89   :  { %1849 = vmatpush2.bf16.msra.mxu1 %v4663_v9  ;;  %1809 = vmatprep.subr.bf16.mxu0 %v4668_v13  ;;  %v4708_v9 = vld [vmem:[#allocation5 + $0x2e8] ss:$16 sps:$4 sm:$0xff]  }
  0x8a   :  { %1850 = vmatprep.subr.bf16.mxu1 %v4671_v14  ;;  %v4714_v13 = vld [vmem:[#allocation5 + $0x2c8] ss:$16 sps:$4 sm:$0xff]  }
  0x8b   :  { %v4717_v14 = vld [vmem:[#allocation5 + $0x4c8] ss:$16 sps:$4 sm:$0xff]  }
  0x8c   :  { %1810 = vmatpush2.bf16.msra.mxu0 %v4666_v18  ;;  %v4723_v18 = vld [vmem:[#allocation5 + $0x4a8] ss:$16 sps:$4 sm:$0xff]  }
  0x8d   :  { %1851 = vmatpush2.bf16.msra.mxu1 %v4669_v19  ;;  %1811 = vmatprep.subr.bf16.mxu0 %v4674_v25  ;;  %v4728_v19 = vld [vmem:[#allocation5 + $0x28c] ss:$16 sps:$4 sm:$0xff]  }
  0x8e   :  { %1852 = vmatprep.subr.bf16.mxu1 %v4677_v26  ;;  %v4737_v25 = vld [vmem:[#allocation5 + $0x46c] ss:$16 sps:$4 sm:$0xff]   ;;  %v4732_v26 = vld [vmem:[#allocation5 + $0x268] ss:$16 sps:$4 sm:$0xff]  }
  0x90   :  { %1812 = vmatpush2.bf16.msra.mxu0 %v4672_v29  ;;  %v4743_v29 = vld [vmem:[#allocation5 + $0x44c] ss:$16 sps:$4 sm:$0xff]  }
  0x91   :  { %1853 = vmatpush2.bf16.msra.mxu1 %v4675_v32  ;;  %1813 = vmatprep.subr.bf16.mxu0 %v4680_v36  ;;  %v4746_v32 = vld [vmem:[#allocation5 + $0x22c] ss:$16 sps:$4 sm:$0xff]  }
  0x92   :  { %1854 = vmatprep.subr.bf16.mxu1 %v4683_v37  ;;  %v4752_v36 = vld [vmem:[#allocation5 + $0x20c] ss:$16 sps:$4 sm:$0xff]  }
  0x93   :  { %v4755_v37 = vld [vmem:[#allocation5 + $0x40c] ss:$16 sps:$4 sm:$0xff]  }
  0x94   :  { %1814 = vmatpush2.bf16.msra.mxu0 %v4678_v40  ;;  %v4758_v40 = vld [vmem:[#allocation5 + $0x3ec] ss:$16 sps:$4 sm:$0xff]  }
  0x95   :  { %1855 = vmatpush2.bf16.msra.mxu1 %v4681_v42  ;;  %1815 = vmatprep.subr.bf16.mxu0 %v4686_v45  ;;  %v4756_v42 = vld [vmem:[#allocation5 + $0x3e8] ss:$16 sps:$4 sm:$0xff]   ;;  %v4767_v45 = vld [vmem:[#allocation5 + $0x5cc] ss:$16 sps:$4 sm:$0xff]  }
  0x96   :  { %1856 = vmatprep.subr.bf16.mxu1 %v4689_v46  ;;  %v4762_v46 = vld [vmem:[#allocation5 + $0x3c8] ss:$16 sps:$4 sm:$0xff]  }
  0x98   :  { %1816 = vmatpush2.bf16.msra.mxu0 %v4684_v49  ;;  %v4773_v49 = vld [vmem:[#allocation5 + $0x5ac] ss:$16 sps:$4 sm:$0xff]  }
  0x99   :  { %1857 = vmatpush2.bf16.msra.mxu1 %v4687_v50  ;;  %1817 = vmatprep.subr.bf16.mxu0 %v4692_v53  ;;  %v4768_v50 = vld [vmem:[#allocation5 + $0x3a8] ss:$16 sps:$4 sm:$0xff]   ;;  %v4779_v53 = vld [vmem:[#allocation5 + $0x58c] ss:$16 sps:$4 sm:$0xff]  }
  0x9a   :  { %1858 = vmatprep.subr.bf16.mxu1 %v4695_v54  ;;  %v4774_v54 = vld [vmem:[#allocation5 + $0x388] ss:$16 sps:$4 sm:$0xff]  }
  0x9c   :  { %1818 = vmatpush2.bf16.msra.mxu0 %v4690_v55  ;;  %v4777_v55 = vld [vmem:[#allocation5 + $0x588] ss:$16 sps:$4 sm:$0xff]  }
  0x9d   :  { %1859 = vmatpush2.bf16.msra.mxu1 %v4693_v56  ;;  %1819 = vmatprep.subr.bf16.mxu0 %v4698_v59  ;;  %v4782_v56 = vld [vmem:[#allocation5 + $0x36c] ss:$16 sps:$4 sm:$0xff]   ;;  %v4783_v59 = vld [vmem:[#allocation5 + $0x568] ss:$16 sps:$4 sm:$0xff]  }
  0x9e   :  { %1860 = vmatprep.subr.bf16.mxu1 %v4701_v60  ;;  %v4788_v60 = vld [vmem:[#allocation5 + $0x34c] ss:$16 sps:$4 sm:$0xff]  }
  0xa0   :  { %1820 = vmatpush2.bf16.msra.mxu0 %v4696_v61  ;;  %v4791_v61 = vld [vmem:[#allocation5 + $0x54c] ss:$16 sps:$4 sm:$0xff]  }
  0xa1   :  { %1861 = vmatpush2.bf16.msra.mxu1 %v4699_v62  ;;  %1821 = vmatprep.subr.bf16.mxu0 %v4704_v1  ;;  %v5438_v62 = vld [vmem:[%s5640_s0] sm:$0xff]  ;;  %v96_v1 = vcombine.high %v5443_v63, %v5443_v63 }
  0xa2   :  { %1862 = vmatprep.subr.bf16.mxu1 %v4707_v2  ;;  %v93_v0 = vcombine.high %v5438_v62, %v5438_v62  ;;  %v5452_v2 = vld [vmem:[%s5640_s0 + $0x8] sm:$0xff] }
  0xa4   :  { %1822 = vmatpush2.bf16.msra.mxu0 %v4702_v3  ;;  %v5457_v3 = vld [vmem:[%s5640_s0 + $0x20] sm:$0xff] }
  0xa5   :  { %1863 = vmatpush2.bf16.msra.mxu1 %v4705_v4  ;;  %1873 = vmatprep.subr.bf16.mxu0 %v4710_v6  ;;  %v94_v4 = vcombine.high %v5452_v2, %v5452_v2  ;;  %v97_v5 = vcombine.high %v5457_v3, %v5457_v3  ;;  %v4786_v6 = vld [vmem:[#allocation5 + $0x348] ss:$16 sps:$4 sm:$0xff]  }
  0xa6   :  { %1914 = vmatprep.subr.bf16.mxu1 %v4713_v7  ;;  %v4789_v7 = vld [vmem:[#allocation5 + $0x548] ss:$16 sps:$4 sm:$0xff]  }
  0xa7   :  { %1824 = vmatmul.mubr.bf16.vlgmr.msra.gmra.mxu0 %v5430_v8 }
  0xa8   :  { %1865 = vmatmul.mubr.bf16.vlgmr.msra.gmra.mxu1 %v5408_v24  ;;  %1874 = vmatpush1.bf16.msra.mxu0 %v4708_v9  ;;  %v4726_v24 = vld [vmem:[#allocation5 + $0x288] ss:$16 sps:$4 sm:$0xff]   ;;  %v113_v9 = vsel %vm105_vm1, %v93_v0, 0.0 }
  0xa9   :  { %1915 = vmatpush1.bf16.msra.mxu1 %v4711_v10  ;;  %1875 = vmatprep.subr.bf16.mxu0 %v4716_v11  ;;  %v155_v10 = vsel %vm105_vm1, %v96_v1, 0.0  ;;  %v114_v11 = vrot.slane %v113_v9, 4 }
  0xaa   :  { %1916 = vmatprep.subr.bf16.mxu1 %v4719_v12  ;;  %1905 = vmatprep.mubr.bf16.mxu0 %v5405_v21  ;;  %v4735_v21 = vld [vmem:[#allocation5 + $0x468] ss:$16 sps:$4 sm:$0xff]   ;;  %v156_v12 = vrot.slane %v155_v10, 4 }
  0xab   :  { %1946 = vmatprep.mubr.bf16.mxu1 %v742_v48  ;;  %v4770_v48 = vld [vmem:[#allocation5 + $0x3ac] ss:$16 sps:$4 sm:$0xff]  }
  0xac   :  { %1876 = vmatpush1.bf16.msra.mxu0 %v4714_v13  ;;  %v127_v13 = vsel %vm105_vm1, %v94_v4, 0.0  ;;  %v4818_v4 = vld [vmem:[#allocation2 + $0xa4] ss:$16 sps:$4 sm:$0xff]  }
  0xad   :  { %1917 = vmatpush1.bf16.msra.mxu1 %v4717_v14  ;;  %1877 = vmatprep.subr.bf16.mxu0 %v4722_v15  ;;  %v169_v14 = vsel %vm105_vm1, %v97_v5, 0.0  ;;  %v4794_v15 = vld [vmem:[#allocation5 + $0x32c] ss:$16 sps:$4 sm:$0xff]   ;;  %v4821_v5 = vld [vmem:[#allocation2 + $0x2a4] ss:$16 sps:$4 sm:$0xff]  }
  0xae   :  { %1918 = vmatprep.subr.bf16.mxu1 %v4725_v16  ;;  %v4797_v16 = vld [vmem:[#allocation5 + $0x52c] ss:$16 sps:$4 sm:$0xff]  }
  0xb0   :  { %1878 = vmatpush1.bf16.msra.mxu0 %v4720_v17  ;;  %v128_v17 = vrot.slane %v127_v13, 4 }
  0xb1   :  { %1919 = vmatpush1.bf16.msra.mxu1 %v4723_v18  ;;  %1879 = vmatprep.subr.bf16.mxu0 %v4728_v19  ;;  %v170_v18 = vrot.slane %v169_v14, 4  ;;  %v115_v19 = vadd.f32 %v114_v11, %v113_v9  ;;  %v4819_v11 = vld [vmem:[#allocation2 + $0x2a0] ss:$16 sps:$4 sm:$0xff]  }
  0xb2   :  { %1920 = vmatprep.subr.bf16.mxu1 %v4731_v20  ;;  %v157_v20 = vadd.f32 %v156_v12, %v155_v10  ;;  %v4816_v10 = vld [vmem:[#allocation2 + $0xa0] ss:$16 sps:$4 sm:$0xff]  }
  0xb4   :  { %1880 = vmatpush1.bf16.msra.mxu0 %v4726_v24  ;;  %v4792_v24 = vld [vmem:[#allocation5 + $0x328] ss:$16 sps:$4 sm:$0xff]  }
  0xb5   :  { %1921 = vmatpush1.bf16.msra.mxu1 %v4729_v22  ;;  %1881 = vmatprep.subr.bf16.mxu0 %v4734_v23  ;;  %v129_v22 = vadd.f32 %v128_v17, %v127_v13  ;;  %v171_v23 = vadd.f32 %v170_v18, %v169_v14  ;;  %v4824_v13 = vld [vmem:[#allocation2 + $0x84] ss:$16 sps:$4 sm:$0xff]  }
  0xb6   :  { %1922 = vmatprep.subr.bf16.mxu1 %v4737_v25  ;;  %v4795_v25 = vld [vmem:[#allocation5 + $0x528] ss:$16 sps:$4 sm:$0xff]   ;;  %v4827_v14 = vld [vmem:[#allocation2 + $0x284] ss:$16 sps:$4 sm:$0xff]  }
  0xb7   :  { %v4830_v17 = vld [vmem:[#allocation2 + $0x64] ss:$16 sps:$4 sm:$0xff]  }
  0xb8   :  { %1882 = vmatpush1.bf16.msra.mxu0 %v4732_v26  ;;  %v4800_v26 = vld [vmem:[#allocation5 + $0x30c] ss:$16 sps:$4 sm:$0xff]   ;;  %v4833_v18 = vld [vmem:[#allocation2 + $0x264] ss:$16 sps:$4 sm:$0xff]  }
  0xb9   :  { %1923 = vmatpush1.bf16.msra.mxu1 %v4735_v21  ;;  %1883 = vmatprep.subr.bf16.mxu0 %v4740_v28  ;;  %v116_v21 = vrot.slane %v115_v19, 2  ;;  %v158_v28 = vrot.slane %v157_v20, 2 }
  0xba   :  { %1924 = vmatprep.subr.bf16.mxu1 %v4743_v29  ;;  %v4803_v29 = vld [vmem:[#allocation5 + $0x50c] ss:$16 sps:$4 sm:$0xff]  }
  0xbc   :  { %1884 = vmatpush1.bf16.msra.mxu0 %v4738_v30  ;;  %v130_v30 = vrot.slane %v129_v22, 2 }
  0xbd   :  { %1925 = vmatpush1.bf16.msra.mxu1 %v4741_v31  ;;  %1885 = vmatprep.subr.bf16.mxu0 %v4746_v32  ;;  %v172_v31 = vrot.slane %v171_v23, 2  ;;  %v117_v32 = vadd.f32 %v116_v21, %v115_v19  ;;  %v4828_v19 = vld [vmem:[#allocation2 + $0x60] ss:$16 sps:$4 sm:$0xff]   ;;  %v106_v21 = vsel %vm105_vm1, %v5438_v62, 0.0 }
  0xbe   :  { %1926 = vmatprep.subr.bf16.mxu1 %v4749_v33  ;;  %v159_v33 = vadd.f32 %v158_v28, %v157_v20  ;;  %v4831_v20 = vld [vmem:[#allocation2 + $0x260] ss:$16 sps:$4 sm:$0xff]   ;;  %v148_v28 = vsel %vm105_vm1, %v5443_v63, 0.0  ;;  %v4848_v63 = vld [vmem:[#allocation2 + $0x4] ss:$16 sps:$4 sm:$0xff]  }
  0xc0   :  { %1886 = vmatpush1.bf16.msra.mxu0 %v4744_v34  ;;  %v4798_v34 = vld [vmem:[#allocation5 + $0x308] ss:$16 sps:$4 sm:$0xff]  }
  0xc1   :  { %1927 = vmatpush1.bf16.msra.mxu1 %v4747_v35  ;;  %1887 = vmatprep.subr.bf16.mxu0 %v4752_v36  ;;  %v4801_v35 = vld [vmem:[#allocation5 + $0x508] ss:$16 sps:$4 sm:$0xff]   ;;  %v131_v36 = vadd.f32 %v130_v30, %v129_v22  ;;  %v4839_v22 = vld [vmem:[#allocation2 + $0x244] ss:$16 sps:$4 sm:$0xff]   ;;  %v120_v30 = vsel %vm105_vm1, %v5452_v2, 0.0 }
  0xc2   :  { %1928 = vmatprep.subr.bf16.mxu1 %v4755_v37  ;;  %v173_v37 = vadd.f32 %v172_v31, %v171_v23  ;;  %v4834_v23 = vld [vmem:[#allocation2 + $0x40] ss:$16 sps:$4 sm:$0xff]   ;;  %v162_v31 = vsel %vm105_vm1, %v5457_v3, 0.0 }
  0xc3   :  { %v163_v62 = vrot.slane %v162_v31, 4  ;;  %v4849_v2 = vld [vmem:[#allocation2 + $0x200] ss:$16 sps:$4 sm:$0xff]  }
  0xc4   :  { %1888 = vmatpush1.bf16.msra.mxu0 %v4750_v38  ;;  %v4806_v38 = vld [vmem:[#allocation2 + $0xe4] ss:$16 sps:$4 sm:$0xff]  }
  0xc5   :  { %1929 = vmatpush1.bf16.msra.mxu1 %v4753_v39  ;;  %1889 = vmatprep.subr.bf16.mxu0 %v4758_v40  ;;  %v118_v39 = vrot.slane %v117_v32, 1  ;;  %v160_v40 = vrot.slane %v159_v33, 1  ;;  %v164_v3 = vadd.f32 %v163_v62, %v162_v31 }
  0xc6   :  { %1930 = vmatprep.subr.bf16.mxu1 %v4761_v41  ;;  %v4809_v41 = vld [vmem:[#allocation2 + $0x2e4] ss:$16 sps:$4 sm:$0xff]  }
  0xc8   :  { %1890 = vmatpush2.bf16.msra.mxu0 %v4756_v42  ;;  %v132_v42 = vrot.slane %v131_v36, 1 }
  0xc9   :  { %1931 = vmatpush2.bf16.msra.mxu1 %v4759_v43  ;;  %1891 = vmatprep.subr.bf16.mxu0 %v4764_v44  ;;  %v174_v43 = vrot.slane %v173_v37, 1  ;;  %v119_v44 = vadd.f32 %v118_v39, %v117_v32  ;;  %v4840_v32 = vld [vmem:[#allocation2 + $0x20] ss:$16 sps:$4 sm:$0xff]  }
  0xca   :  { %1932 = vmatprep.subr.bf16.mxu1 %v4767_v45  ;;  %v161_v45 = vadd.f32 %v160_v40, %v159_v33  ;;  %v107_v33 = vrot.slane %v106_v21, 4 }
  0xcc   :  { %1892 = vmatpush2.bf16.msra.mxu0 %v4762_v46  ;;  %v4804_v46 = vld [vmem:[#allocation2 + $0xe0] ss:$16 sps:$4 sm:$0xff]   ;;  %v108_v39 = vadd.f32 %v107_v33, %v106_v21  ;;  %v4881_v33 = vld [vmem:[#allocation2 + $0x364] ss:$16 sps:$4 sm:$0xff]  }
  0xcd   :  { %1933 = vmatpush2.bf16.msra.mxu1 %v4765_v47  ;;  %1893 = vmatprep.subr.bf16.mxu0 %v4770_v48  ;;  %v133_v47 = vadd.f32 %v132_v42, %v131_v36  ;;  %v175_v48 = vadd.f32 %v174_v43, %v173_v37  ;;  %v121_v36 = vrot.slane %v120_v30, 4  ;;  %v4851_v37 = vld [vmem:[#allocation2 + $0x204] ss:$16 sps:$4 sm:$0xff]  }
  0xce   :  { %1934 = vmatprep.subr.bf16.mxu1 %v4773_v49  ;;  %v4807_v49 = vld [vmem:[#allocation2 + $0x2e0] ss:$16 sps:$4 sm:$0xff]   ;;  %v4854_v42 = vld [vmem:[#allocation2 + $0x1e4] ss:$16 sps:$4 sm:$0xff]  }
  0xcf   :  { %v4857_v43 = vld [vmem:[#allocation2 + $0x3e4] ss:$16 sps:$4 sm:$0xff]  }
  0xd0   :  { %1894 = vmatpush2.bf16.msra.mxu0 %v4768_v50  ;;  %v191_v50 = vmul.f32 0.25, %v119_v44  ;;  %v4852_v44 = vld [vmem:[#allocation2 + $0x1e0] ss:$16 sps:$4 sm:$0xff]  }
  0xd1   :  { %1935 = vmatpush2.bf16.msra.mxu1 %v4771_v51  ;;  %1895 = vmatprep.subr.bf16.mxu0 %v4776_v52  ;;  %v197_v51 = vmul.f32 0.25, %v161_v45  ;;  %v4812_v52 = vld [vmem:[#allocation2 + $0xc4] ss:$16 sps:$4 sm:$0xff]   ;;  %v4855_v45 = vld [vmem:[#allocation2 + $0x3e0] ss:$16 sps:$4 sm:$0xff]  }
  0xd2   :  { %1936 = vmatprep.subr.bf16.mxu1 %v4779_v53  ;;  %v4815_v53 = vld [vmem:[#allocation2 + $0x2c4] ss:$16 sps:$4 sm:$0xff]  }
  0xd4   :  { %1896 = vmatpush2.bf16.msra.mxu0 %v4774_v54  ;;  %v193_v54 = vmul.f32 0.25, %v133_v47 }
  0xd5   :  { %1937 = vmatpush2.bf16.msra.mxu1 %v4777_v55  ;;  %1897 = vmatprep.subr.bf16.mxu0 %v4782_v56  ;;  %v199_v55 = vmul.f32 0.25, %v175_v48  ;;  %v299_v56 = vpack.c.bf16 %v191_v50, %v191_v50  ;;  %v5488_v48 = vld [vmem:[%s5640_s0 + $0x10] sm:$0xff] }
  0xd6   :  { %1938 = vmatprep.subr.bf16.mxu1 %v4785_v57  ;;  %v305_v57 = vpack.c.bf16 %v197_v51, %v197_v51  ;;  %v4860_v50 = vld [vmem:[#allocation2 + $0x1c4] ss:$16 sps:$4 sm:$0xff]  }
  0xd7   :  { %v1968_v0 = vunpack.c.l.b16 %v299_v56 }
  0xd8   :  { %1898 = vmatpush2.bf16.msra.mxu0 %v4780_v58  ;;  %v4810_v58 = vld [vmem:[#allocation2 + $0xc0] ss:$16 sps:$4 sm:$0xff]   ;;  %v1974_v1 = vunpack.c.l.b16 %v305_v57 }
  0xd9   :  { %1939 = vmatpush2.bf16.msra.mxu1 %v4783_v59  ;;  %1899 = vmatprep.subr.bf16.mxu0 %v4788_v60  ;;  %v301_v59 = vpack.c.bf16 %v193_v54, %v193_v54  ;;  %v307_v60 = vpack.c.bf16 %v199_v55, %v199_v55  ;;  %v4863_v55 = vld [vmem:[#allocation2 + $0x3c4] ss:$16 sps:$4 sm:$0xff]  }
  0xda   :  { %1940 = vmatprep.subr.bf16.mxu1 %v4791_v61  ;;  %v4813_v61 = vld [vmem:[#allocation2 + $0x2c0] ss:$16 sps:$4 sm:$0xff]   ;;  %v1980_v9 = vsel %vm730_vm0, %v1974_v1, %v1968_v0  ;;  %v4866_v1 = vld [vmem:[#allocation2 + $0x1a4] ss:$16 sps:$4 sm:$0xff]  }
  0xdb   :  { %v4861_v0 = vld [vmem:[#allocation2 + $0x3c0] ss:$16 sps:$4 sm:$0xff]  }
  0xdc   :  { %1900 = vmatpush2.bf16.msra.mxu0 %v4786_v6  ;;  %v1970_v6 = vunpack.c.l.b16 %v301_v59 }
  0xdd   :  { %1941 = vmatpush2.bf16.msra.mxu1 %v4789_v7  ;;  %1901 = vmatprep.subr.bf16.mxu0 %v4794_v15  ;;  %v1976_v7 = vunpack.c.l.b16 %v307_v60  ;;  %v4822_v15 = vld [vmem:[#allocation2 + $0x80] ss:$16 sps:$4 sm:$0xff]  }
  0xde   :  { %1942 = vmatprep.subr.bf16.mxu1 %v4797_v16  ;;  %v4825_v16 = vld [vmem:[#allocation2 + $0x280] ss:$16 sps:$4 sm:$0xff]  }
  0xe0   :  { %1902 = vmatpush2.bf16.msra.mxu0 %v4792_v24  ;;  %v4836_v24 = vld [vmem:[#allocation2 + $0x44] ss:$16 sps:$4 sm:$0xff]  }
  0xe1   :  { %1943 = vmatpush2.bf16.msra.mxu1 %v4795_v25  ;;  %1903 = vmatprep.subr.bf16.mxu0 %v4800_v26  ;;  %v4837_v25 = vld [vmem:[#allocation2 + $0x240] ss:$16 sps:$4 sm:$0xff]   ;;  %v4842_v26 = vld [vmem:[#allocation2 + $0x24] ss:$16 sps:$4 sm:$0xff]  }
  0xe2   :  { %1944 = vmatprep.subr.bf16.mxu1 %v4803_v29  ;;  %v4845_v29 = vld [vmem:[#allocation2 + $0x224] ss:$16 sps:$4 sm:$0xff]  }
  0xe4   :  { %1904 = vmatpush2.bf16.msra.mxu0 %v4798_v34  ;;  %v149_v34 = vrot.slane %v148_v28, 4 }
  0xe5   :  { %1945 = vmatpush2.bf16.msra.mxu1 %v4801_v35  ;;  %2957 = vmatprep.subr.bf16.mxu0 %v4806_v38  ;;  %v4843_v35 = vld [vmem:[#allocation2 + $0x220] ss:$16 sps:$4 sm:$0xff]  }
  0xe6   :  { %2998 = vmatprep.subr.bf16.mxu1 %v4809_v41  ;;  %v4846_v38 = vld [vmem:[#allocation2] ss:$16 sps:$4 sm:$0xff]   ;;  %v150_v40 = vadd.f32 %v149_v34, %v148_v28  ;;  %v122_v41 = vadd.f32 %v121_v36, %v120_v30 }
  0xe7   :  { %1906 = vmatmul.mubr.bf16.vlgmr.msra.gmra.mxu0 %v5412_v27  ;;  %v5470_v27 = vpack.c.b16 %v1980_v9, %v1980_v9  ;;  %v4873_v28 = vld [vmem:[#allocation2 + $0x380] ss:$16 sps:$4 sm:$0xff]  }
  0xe8   :  { %1947 = vmatmul.mubr.bf16.vlgmr.msra.gmra.mxu1 %v5430_v8  ;;  %2958 = vmatpush1.bf16.msra.mxu0 %v4804_v46  ;;  %v1982_v8 = vsel %vm730_vm0, %v1976_v7, %v1970_v6  ;;  %v109_v46 = vrot.slane %v108_v39, 2  ;;  %v151_v47 = vrot.slane %v150_v40, 2  ;;  %v123_v51 = vrot.slane %v122_v41, 2  ;;  %v4869_v7 = vld [vmem:[#allocation2 + $0x3a4] ss:$16 sps:$4 sm:$0xff]  }
  0xe9   :  { %2999 = vmatpush1.bf16.msra.mxu1 %v4807_v49  ;;  %2959 = vmatprep.subr.bf16.mxu0 %v4812_v52  ;;  %v5473_v12 = vpack.c.b16 %v1982_v8, %v1982_v8  ;;  %v5493_v49 = vld [vmem:[%s5640_s0 + $0x28] sm:$0xff]  ;;  %v165_v52 = vrot.slane %v164_v3, 2  ;;  %v4864_v8 = vld [vmem:[#allocation2 + $0x1a0] ss:$16 sps:$4 sm:$0xff]  }
  0xea   :  { %3000 = vmatprep.subr.bf16.mxu1 %v4815_v53  ;;  %2989 = vmatprep.mubr.bf16.mxu0 %v5470_v27  ;;  %v95_v53 = vcombine.high %v5488_v48, %v5488_v48  ;;  %v98_v54 = vcombine.high %v5493_v49, %v5493_v49  ;;  %v110_v59 = vadd.f32 %v109_v46, %v108_v39  ;;  %v4876_v34 = vld [vmem:[#allocation2 + $0x160] ss:$16 sps:$4 sm:$0xff]  }
  0xeb   :  { %3030 = vmatprep.mubr.bf16.mxu1 %v5473_v12  ;;  %v166_v6 = vadd.f32 %v165_v52, %v164_v3  ;;  %v4885_v3 = vld [vmem:[#allocation2 + $0x340] ss:$16 sps:$4 sm:$0xff]  }
  0xec   :  { %2960 = vmatpush1.bf16.msra.mxu0 %v4810_v58  ;;  %v141_v56 = vsel %vm105_vm1, %v95_v53, 0.0  ;;  %v183_v57 = vsel %vm105_vm1, %v98_v54, 0.0  ;;  %v4858_v58 = vld [vmem:[#allocation2 + $0x1c0] ss:$16 sps:$4 sm:$0xff]  }
  0xed   :  { %3001 = vmatpush1.bf16.msra.mxu1 %v4813_v61  ;;  %2961 = vmatprep.subr.bf16.mxu0 %v4818_v4  ;;  %v142_v60 = vrot.slane %v141_v56, 4  ;;  %v184_v61 = vrot.slane %v183_v57, 4  ;;  %v152_v4 = vadd.f32 %v151_v47, %v150_v40  ;;  %v4888_v52 = vld [vmem:[#allocation2 + $0x120] ss:$16 sps:$4 sm:$0xff]  }
  0xee   :  { %3002 = vmatprep.subr.bf16.mxu1 %v4821_v5  ;;  %v124_v5 = vadd.f32 %v123_v51, %v122_v41  ;;  %v4882_v41 = vld [vmem:[#allocation2 + $0x140] ss:$16 sps:$4 sm:$0xff]   ;;  %v4893_v51 = vld [vmem:[#allocation2 + $0x324] ss:$16 sps:$4 sm:$0xff]  }
  0xef   :  { %v143_v9 = vadd.f32 %v142_v60, %v141_v56  ;;  %v4891_v53 = vld [vmem:[#allocation2 + $0x320] ss:$16 sps:$4 sm:$0xff]   ;;  %v4896_v56 = vld [vmem:[#allocation2 + $0x104] ss:$16 sps:$4 sm:$0xff]  }
  0xf0   :  { %2962 = vmatpush1.bf16.msra.mxu0 %v4816_v10  ;;  %v185_v10 = vadd.f32 %v184_v61, %v183_v57  ;;  %v4899_v61 = vld [vmem:[#allocation2 + $0x304] ss:$16 sps:$4 sm:$0xff]  }
  0xf1   :  { %3003 = vmatpush1.bf16.msra.mxu1 %v4819_v11  ;;  %2963 = vmatprep.subr.bf16.mxu0 %v4824_v13  ;;  %v4867_v11 = vld [vmem:[#allocation2 + $0x3a0] ss:$16 sps:$4 sm:$0xff]   ;;  %v111_v13 = vrot.slane %v110_v59, 1 }
  0xf2   :  { %3004 = vmatprep.subr.bf16.mxu1 %v4827_v14  ;;  %v144_v14 = vrot.slane %v143_v9, 2 }
  0xf4   :  { %2964 = vmatpush1.bf16.msra.mxu0 %v4822_v15  ;;  %v186_v15 = vrot.slane %v185_v10, 2 }
  0xf5   :  { %3005 = vmatpush1.bf16.msra.mxu1 %v4825_v16  ;;  %2965 = vmatprep.subr.bf16.mxu0 %v4830_v17  ;;  %v4872_v16 = vld [vmem:[#allocation2 + $0x184] ss:$16 sps:$4 sm:$0xff]   ;;  %v153_v17 = vrot.slane %v152_v4, 1 }
  0xf6   :  { %3006 = vmatprep.subr.bf16.mxu1 %v4833_v18  ;;  %v125_v18 = vrot.slane %v124_v5, 1 }
  0xf7   :  { %v154_v30 = vadd.f32 %v153_v17, %v152_v4  ;;  %v4915_v17 = vld [vmem:[#allocation2 + $0xcc] ss:$16 sps:$4 sm:$0xff]  }
  0xf8   :  { %2966 = vmatpush1.bf16.msra.mxu0 %v4828_v19  ;;  %v167_v19 = vrot.slane %v166_v6, 1  ;;  %v126_v31 = vadd.f32 %v125_v18, %v124_v5 }
  0xf9   :  { %3007 = vmatpush1.bf16.msra.mxu1 %v4831_v20  ;;  %2967 = vmatprep.subr.bf16.mxu0 %v4836_v24  ;;  %v4875_v20 = vld [vmem:[#allocation2 + $0x384] ss:$16 sps:$4 sm:$0xff]   ;;  %v145_v24 = vadd.f32 %v144_v14, %v143_v9  ;;  %v4907_v14 = vld [vmem:[#allocation2 + $0xe8] ss:$16 sps:$4 sm:$0xff]  }
  0xfa   :  { %3008 = vmatprep.subr.bf16.mxu1 %v4839_v22  ;;  %v187_v22 = vadd.f32 %v186_v15, %v185_v10  ;;  %v192_v39 = vmul.f32 0.25, %v126_v31  ;;  %v4906_v9 = vld [vmem:[#allocation2 + $0x4e4] ss:$16 sps:$4 sm:$0xff]   ;;  %v4909_v10 = vld [vmem:[#allocation2 + $0xec] ss:$16 sps:$4 sm:$0xff]  }
  0xfc   :  { %2968 = vmatpush1.bf16.msra.mxu0 %v4834_v23  ;;  %v4870_v23 = vld [vmem:[#allocation2 + $0x180] ss:$16 sps:$4 sm:$0xff]   ;;  %v188_v21 = vrot.slane %v187_v22, 1  ;;  %v300_v47 = vpack.c.bf16 %v192_v39, %v192_v39  ;;  %v4933_v39 = vld [vmem:[#allocation2 + $0x6c] ss:$16 sps:$4 sm:$0xff]  }
  0xfd   :  { %3009 = vmatpush1.bf16.msra.mxu1 %v4837_v25  ;;  %2969 = vmatprep.subr.bf16.mxu0 %v4842_v26  ;;  %v112_v25 = vadd.f32 %v111_v13, %v110_v59  ;;  %v146_v26 = vrot.slane %v145_v24, 1  ;;  %v4904_v13 = vld [vmem:[#allocation2 + $0x4e0] ss:$16 sps:$4 sm:$0xff]  }
  0xfe   :  { %3010 = vmatprep.subr.bf16.mxu1 %v4845_v29  ;;  %v4878_v29 = vld [vmem:[#allocation2 + $0x164] ss:$16 sps:$4 sm:$0xff]   ;;  %v1969_v59 = vunpack.c.l.b16 %v300_v47 }
  0xff   :  { %v190_v36 = vmul.f32 0.25, %v112_v25  ;;  %v147_v62 = vadd.f32 %v146_v26, %v145_v24  ;;  %v4910_v24 = vld [vmem:[#allocation2 + $0x4c0] ss:$16 sps:$4 sm:$0xff]   ;;  %v4918_v25 = vld [vmem:[#allocation2 + $0x4a4] ss:$16 sps:$4 sm:$0xff]  }
 0x100   :  { %2970 = vmatpush1.bf16.msra.mxu0 %v4840_v32  ;;  %v168_v32 = vadd.f32 %v167_v19, %v166_v6  ;;  %v4942_v47 = vld [vmem:[#allocation2 + $0x424] ss:$16 sps:$4 sm:$0xff]  }
 0x101   :  { %3011 = vmatpush1.bf16.msra.mxu1 %v4843_v35  ;;  %2971 = vmatprep.subr.bf16.mxu0 %v4848_v63  ;;  %v4879_v35 = vld [vmem:[#allocation2 + $0x360] ss:$16 sps:$4 sm:$0xff]   ;;  %v189_v63 = vadd.f32 %v188_v21, %v187_v22  ;;  %v4913_v22 = vld [vmem:[#allocation2 + $0xc8] ss:$16 sps:$4 sm:$0xff]  }
 0x102   :  { %3012 = vmatprep.subr.bf16.mxu1 %v4851_v37  ;;  %v4884_v37 = vld [vmem:[#allocation2 + $0x144] ss:$16 sps:$4 sm:$0xff]   ;;  %v198_v40 = vmul.f32 0.25, %v168_v32  ;;  %v4916_v32 = vld [vmem:[#allocation2 + $0x4a0] ss:$16 sps:$4 sm:$0xff]  }
 0x104   :  { %2972 = vmatpush1.bf16.msra.mxu0 %v4846_v38  ;;  %v196_v38 = vmul.f32 0.25, %v154_v30 }
 0x105   :  { %3013 = vmatpush1.bf16.msra.mxu1 %v4849_v2  ;;  %2973 = vmatprep.subr.bf16.mxu0 %v4854_v42  ;;  %v4887_v2 = vld [vmem:[#allocation2 + $0x344] ss:$16 sps:$4 sm:$0xff]   ;;  %v298_v42 = vpack.c.bf16 %v190_v36, %v190_v36 }
 0x106   :  { %3014 = vmatprep.subr.bf16.mxu1 %v4857_v43  ;;  %v195_v43 = vmul.f32 0.25, %v147_v62  ;;  %v304_v46 = vpack.c.bf16 %v196_v38, %v196_v38  ;;  %v4927_v62 = vld [vmem:[#allocation2 + $0x8c] ss:$16 sps:$4 sm:$0xff]   ;;  %v4930_v38 = vld [vmem:[#allocation2 + $0x464] ss:$16 sps:$4 sm:$0xff]  }
 0x107   :  { %v1967_v57 = vunpack.c.l.b16 %v298_v42  ;;  %v4939_v42 = vld [vmem:[#allocation2 + $0x4c] ss:$16 sps:$4 sm:$0xff]  }
 0x108   :  { %2974 = vmatpush2.bf16.msra.mxu0 %v4852_v44  ;;  %v201_v44 = vmul.f32 0.25, %v189_v63  ;;  %v303_v54 = vpack.c.bf16 %v195_v43, %v195_v43  ;;  %v4922_v63 = vld [vmem:[#allocation2 + $0x480] ss:$16 sps:$4 sm:$0xff]  }
 0x109   :  { %3015 = vmatpush2.bf16.msra.mxu1 %v4855_v45  ;;  %2975 = vmatprep.subr.bf16.mxu0 %v4860_v50  ;;  %v4890_v45 = vld [vmem:[#allocation2 + $0x124] ss:$16 sps:$4 sm:$0xff]   ;;  %v306_v50 = vpack.c.bf16 %v198_v40, %v198_v40  ;;  %v176_v40 = vsel %vm105_vm1, %v5493_v49, 0.0  ;;  %v4940_v49 = vld [vmem:[#allocation2 + $0x420] ss:$16 sps:$4 sm:$0xff]  }
 0x10a   :  { %3016 = vmatprep.subr.bf16.mxu1 %v4863_v55  ;;  %v309_v55 = vpack.c.bf16 %v201_v44, %v201_v44  ;;  %v1972_v4 = vunpack.c.l.b16 %v303_v54  ;;  %v177_v44 = vrot.slane %v176_v40, 4  ;;  %v4951_v54 = vld [vmem:[#allocation2 + $0xc] ss:$16 sps:$4 sm:$0xff]  }
 0x10b   :  { %v1975_v60 = vunpack.c.l.b16 %v306_v50  ;;  %v4945_v50 = vld [vmem:[#allocation2 + $0x2c] ss:$16 sps:$4 sm:$0xff]  }
 0x10c   :  { %2976 = vmatpush2.bf16.msra.mxu0 %v4858_v58  ;;  %v1973_v58 = vunpack.c.l.b16 %v304_v46  ;;  %v1978_v5 = vunpack.c.l.b16 %v309_v55  ;;  %v4937_v46 = vld [vmem:[#allocation2 + $0x48] ss:$16 sps:$4 sm:$0xff]  }
 0x10d   :  { %3017 = vmatpush2.bf16.msra.mxu1 %v4861_v0  ;;  %2977 = vmatprep.subr.bf16.mxu0 %v4866_v1  ;;  %v4894_v0 = vld [vmem:[#allocation2 + $0x100] ss:$16 sps:$4 sm:$0xff]  }
 0x10e   :  { %3018 = vmatprep.subr.bf16.mxu1 %v4869_v7  ;;  %v4897_v1 = vld [vmem:[#allocation2 + $0x300] ss:$16 sps:$4 sm:$0xff]   ;;  %v1979_v6 = vsel %vm730_vm0, %v1973_v58, %v1967_v57  ;;  %v1981_v7 = vsel %vm730_vm0, %v1975_v60, %v1969_v59  ;;  %v1984_v15 = vsel %vm730_vm0, %v1978_v5, %v1972_v4  ;;  %v4949_v58 = vld [vmem:[#allocation2 + $0x8] ss:$16 sps:$4 sm:$0xff]   ;;  %v4954_v59 = vld [vmem:[#allocation2 + $0x5e4] ss:$16 sps:$4 sm:$0xff]  }
 0x10f   :  { %v5508_v18 = vpack.c.b16 %v1984_v15, %v1984_v15  ;;  %v4946_v57 = vld [vmem:[#allocation2 + $0x400] ss:$16 sps:$4 sm:$0xff]   ;;  %v4957_v60 = vld [vmem:[#allocation2 + $0x1ec] ss:$16 sps:$4 sm:$0xff]   ;;  %v4955_v4 = vld [vmem:[#allocation2 + $0x1e8] ss:$16 sps:$4 sm:$0xff]  }
 0x110   :  { %2978 = vmatpush2.bf16.msra.mxu0 %v4864_v8  ;;  %v5503_v8 = vpack.c.b16 %v1979_v6, %v1979_v6  ;;  %v4960_v5 = vld [vmem:[#allocation2 + $0x5c4] ss:$16 sps:$4 sm:$0xff]   ;;  %v4963_v6 = vld [vmem:[#allocation2 + $0x1cc] ss:$16 sps:$4 sm:$0xff]  }
 0x111   :  { %3019 = vmatpush2.bf16.msra.mxu1 %v4867_v11  ;;  %2979 = vmatprep.subr.bf16.mxu0 %v4872_v16  ;;  %v5505_v11 = vpack.c.b16 %v1981_v7, %v1981_v7  ;;  %v4912_v16 = vld [vmem:[#allocation2 + $0x4c4] ss:$16 sps:$4 sm:$0xff]   ;;  %v4969_v15 = vld [vmem:[#allocation2 + $0x1ac] ss:$16 sps:$4 sm:$0xff]  }
 0x112   :  { %3020 = vmatprep.subr.bf16.mxu1 %v4875_v20 }
 0x114   :  { %2980 = vmatpush2.bf16.msra.mxu0 %v4870_v23 }
 0x115   :  { %3021 = vmatpush2.bf16.msra.mxu1 %v4873_v28  ;;  %2981 = vmatprep.subr.bf16.mxu0 %v4878_v29  ;;  %v4921_v28 = vld [vmem:[#allocation2 + $0xac] ss:$16 sps:$4 sm:$0xff]  }
 0x116   :  { %3022 = vmatprep.subr.bf16.mxu1 %v4881_v33  ;;  %v4919_v33 = vld [vmem:[#allocation2 + $0xa8] ss:$16 sps:$4 sm:$0xff]  }
 0x118   :  { %2982 = vmatpush2.bf16.msra.mxu0 %v4876_v34  ;;  %v4924_v34 = vld [vmem:[#allocation2 + $0x484] ss:$16 sps:$4 sm:$0xff]  }
 0x119   :  { %3023 = vmatpush2.bf16.msra.mxu1 %v4879_v35  ;;  %2983 = vmatprep.subr.bf16.mxu0 %v4884_v37  ;;  %v4925_v37 = vld [vmem:[#allocation2 + $0x88] ss:$16 sps:$4 sm:$0xff]  }
 0x11a   :  { %3024 = vmatprep.subr.bf16.mxu1 %v4887_v2  ;;  %v4928_v2 = vld [vmem:[#allocation2 + $0x460] ss:$16 sps:$4 sm:$0xff]  }
 0x11c   :  { %2984 = vmatpush2.bf16.msra.mxu0 %v4882_v41  ;;  %v4931_v41 = vld [vmem:[#allocation2 + $0x68] ss:$16 sps:$4 sm:$0xff]  }
 0x11d   :  { %3025 = vmatpush2.bf16.msra.mxu1 %v4885_v3  ;;  %2985 = vmatprep.subr.bf16.mxu0 %v4890_v45  ;;  %v4936_v3 = vld [vmem:[#allocation2 + $0x444] ss:$16 sps:$4 sm:$0xff]   ;;  %v4934_v45 = vld [vmem:[#allocation2 + $0x440] ss:$16 sps:$4 sm:$0xff]  }
 0x11e   :  { %3026 = vmatprep.subr.bf16.mxu1 %v4893_v51  ;;  %v178_v51 = vadd.f32 %v177_v44, %v176_v40  ;;  %v4991_v40 = vld [vmem:[#allocation2 + $0x128] ss:$16 sps:$4 sm:$0xff]  }
 0x11f   :  { %v4997_v44 = vld [vmem:[#allocation2 + $0x108] ss:$16 sps:$4 sm:$0xff]  }
 0x120   :  { %2986 = vmatpush2.bf16.msra.mxu0 %v4888_v52  ;;  %v4943_v52 = vld [vmem:[#allocation2 + $0x28] ss:$16 sps:$4 sm:$0xff]  }
 0x121   :  { %3027 = vmatpush2.bf16.msra.mxu1 %v4891_v53  ;;  %2987 = vmatprep.subr.bf16.mxu0 %v4896_v56  ;;  %v4948_v53 = vld [vmem:[#allocation2 + $0x404] ss:$16 sps:$4 sm:$0xff]   ;;  %v179_v56 = vrot.slane %v178_v51, 2 }
 0x122   :  { %3028 = vmatprep.subr.bf16.mxu1 %v4899_v61 }
 0x124   :  { %2988 = vmatpush2.bf16.msra.mxu0 %v4894_v0  ;;  %v180_v0 = vadd.f32 %v179_v56, %v178_v51  ;;  %v5005_v51 = vld [vmem:[#allocation2 + $0x4e8] ss:$16 sps:$4 sm:$0xff]  }
 0x125   :  { %3029 = vmatpush2.bf16.msra.mxu1 %v4897_v1  ;;  %3039 = vmatprep.subr.bf16.mxu0 %v4906_v9  ;;  %v4952_v1 = vld [vmem:[#allocation2 + $0x5e0] ss:$16 sps:$4 sm:$0xff]   ;;  %v5008_v56 = vld [vmem:[#allocation2 + $0x2c8] ss:$16 sps:$4 sm:$0xff]  }
 0x126   :  { %3080 = vmatprep.subr.bf16.mxu1 %v4909_v10  ;;  %v181_v9 = vrot.slane %v180_v0, 1  ;;  %v4958_v10 = vld [vmem:[#allocation2 + $0x5c0] ss:$16 sps:$4 sm:$0xff]  }
 0x127   :  { %v1743_v19 = vpop.f32.mrf.mxu0  ;;  %2990 = vmatmul.mubr.bf16.vlgmr.msra.gmra.mxu0 %v5503_v8 }
 0x128   :  { %v1784_v20 = vpop.f32.mrf.mxu1  ;;  %3031 = vmatmul.mubr.bf16.vlgmr.msra.gmra.mxu1 %v5505_v11  ;;  %3040 = vmatpush1.bf16.msra.mxu0 %v4904_v13  ;;  %v4961_v13 = vld [vmem:[#allocation2 + $0x1c8] ss:$16 sps:$4 sm:$0xff]  }
 0x129   :  { %v5512_v23 = vadd.f32 %v1784_v20, %v1743_v19  ;;  %3081 = vmatpush1.bf16.msra.mxu1 %v4907_v14  ;;  %v1745_v26 = vpop.f32.mrf.mxu0  ;;  %3041 = vmatprep.subr.bf16.mxu0 %v4912_v16  ;;  %v4966_v14 = vld [vmem:[#allocation2 + $0x5a4] ss:$16 sps:$4 sm:$0xff]   ;;  %v4964_v16 = vld [vmem:[#allocation2 + $0x5a0] ss:$16 sps:$4 sm:$0xff]   ;;  %v4975_v20 = vld [vmem:[#allocation2 + $0x18c] ss:$16 sps:$4 sm:$0xff]  }
 0x12a   :  { %v1786_v21 = vpop.f32.mrf.mxu1  ;;  %3082 = vmatprep.subr.bf16.mxu1 %v4915_v17  ;;  %3071 = vmatprep.mubr.bf16.mxu0 %v5508_v18  ;;  %v4967_v17 = vld [vmem:[#allocation2 + $0x1a8] ss:$16 sps:$4 sm:$0xff]   ;;  %v4972_v19 = vld [vmem:[#allocation2 + $0x584] ss:$16 sps:$4 sm:$0xff]  }
 0x12b   :  { %v5514_v29 = vadd.f32 %v1786_v21, %v1745_v26  ;;  %3112 = vmatprep.mubr.bf16.mxu1 %v5470_v27  ;;  %v1747_v30 = vpop.f32.mrf.mxu0  ;;  %v134_v27 = vsel %vm105_vm1, %v5488_v48, 0.0  ;;  %v182_v26 = vadd.f32 %v181_v9, %v180_v0  ;;  %v4978_v21 = vld [vmem:[#allocation2 + $0x564] ss:$16 sps:$4 sm:$0xff]   ;;  %v5025_v9 = vld [vmem:[#allocation2 + $0x48c] ss:$16 sps:$4 sm:$0xff]  }
 0x12c   :  { %v1788_v31 = vpop.f32.mrf.mxu1  ;;  %3042 = vmatpush1.bf16.msra.mxu0 %v4910_v24  ;;  %v135_v43 = vrot.slane %v134_v27, 4  ;;  %v4970_v24 = vld [vmem:[#allocation2 + $0x580] ss:$16 sps:$4 sm:$0xff]  }
 0x12d   :  { %3083 = vmatpush1.bf16.msra.mxu1 %v4913_v22  ;;  %v1748_v35 = vpop.f32.mrf.mxu0  ;;  %3043 = vmatprep.subr.bf16.mxu0 %v4918_v25  ;;  %v4973_v22 = vld [vmem:[#allocation2 + $0x188] ss:$16 sps:$4 sm:$0xff]   ;;  %v4976_v30 = vld [vmem:[#allocation2 + $0x560] ss:$16 sps:$4 sm:$0xff]  }
 0x12e   :  { %v1789_v36 = vpop.f32.mrf.mxu1  ;;  %3084 = vmatprep.subr.bf16.mxu1 %v4921_v28  ;;  %v136_v48 = vadd.f32 %v135_v43, %v134_v27  ;;  %v4981_v28 = vld [vmem:[#allocation2 + $0x16c] ss:$16 sps:$4 sm:$0xff]   ;;  %v4979_v31 = vld [vmem:[#allocation2 + $0x168] ss:$16 sps:$4 sm:$0xff]   ;;  %v4988_v27 = vld [vmem:[#allocation2 + $0x520] ss:$16 sps:$4 sm:$0xff]  }
 0x12f   :  { %v4987_v35 = vld [vmem:[#allocation2 + $0x14c] ss:$16 sps:$4 sm:$0xff]   ;;  %v4982_v36 = vld [vmem:[#allocation2 + $0x540] ss:$16 sps:$4 sm:$0xff]  }
 0x130   :  { %3044 = vmatpush1.bf16.msra.mxu0 %v4916_v32  ;;  %v137_v55 = vrot.slane %v136_v48, 2  ;;  %v4994_v43 = vld [vmem:[#allocation2 + $0x500] ss:$16 sps:$4 sm:$0xff]  }
 0x131   :  { %3085 = vmatpush1.bf16.msra.mxu1 %v4919_v33  ;;  %3045 = vmatprep.subr.bf16.mxu0 %v4924_v34  ;;  %v200_v33 = vmul.f32 0.25, %v182_v26  ;;  %v4984_v34 = vld [vmem:[#allocation2 + $0x544] ss:$16 sps:$4 sm:$0xff]   ;;  %v5046_v26 = vld [vmem:[#allocation2 + $0x20c] ss:$16 sps:$4 sm:$0xff]  }
 0x132   :  { %3086 = vmatprep.subr.bf16.mxu1 %v4927_v62  ;;  %v138_v61 = vadd.f32 %v137_v55, %v136_v48  ;;  %v4985_v62 = vld [vmem:[#allocation2 + $0x148] ss:$16 sps:$4 sm:$0xff]  }
 0x133   :  { %v5002_v48 = vld [vmem:[#allocation2 + $0x2e8] ss:$16 sps:$4 sm:$0xff]  }
 0x134   :  { %3046 = vmatpush1.bf16.msra.mxu0 %v4922_v63  ;;  %v139_v7 = vrot.slane %v138_v61, 1 }
 0x135   :  { %3087 = vmatpush1.bf16.msra.mxu1 %v4925_v37  ;;  %3047 = vmatprep.subr.bf16.mxu0 %v4930_v38  ;;  %v308_v37 = vpack.c.bf16 %v200_v33, %v200_v33  ;;  %v4990_v38 = vld [vmem:[#allocation2 + $0x524] ss:$16 sps:$4 sm:$0xff]   ;;  %v5050_v33 = vld [vmem:[#allocation2 + $0x3e8] ss:$16 sps:$4 sm:$0xff]  }
 0x136   :  { %3088 = vmatprep.subr.bf16.mxu1 %v4933_v39  ;;  %v140_v25 = vadd.f32 %v139_v7, %v138_v61  ;;  %v4993_v39 = vld [vmem:[#allocation2 + $0x12c] ss:$16 sps:$4 sm:$0xff]  }
 0x137   :  { %v5019_v61 = vld [vmem:[#allocation2 + $0x4ac] ss:$16 sps:$4 sm:$0xff]  }
 0x138   :  { %3048 = vmatpush1.bf16.msra.mxu0 %v4928_v2  ;;  %v194_v32 = vmul.f32 0.25, %v140_v25  ;;  %v5022_v7 = vld [vmem:[#allocation2 + $0x28c] ss:$16 sps:$4 sm:$0xff]   ;;  %v5041_v25 = vld [vmem:[#allocation2 + $0x428] ss:$16 sps:$4 sm:$0xff]  }
 0x139   :  { %3089 = vmatpush1.bf16.msra.mxu1 %v4931_v41  ;;  %3049 = vmatprep.subr.bf16.mxu0 %v4936_v3  ;;  %v1977_v41 = vunpack.c.l.b16 %v308_v37  ;;  %v4996_v3 = vld [vmem:[#allocation2 + $0x504] ss:$16 sps:$4 sm:$0xff]   ;;  %v5064_v37 = vld [vmem:[#allocation2 + $0x3ac] ss:$16 sps:$4 sm:$0xff]  }
 0x13a   :  { %3090 = vmatprep.subr.bf16.mxu1 %v4939_v42  ;;  %v302_v63 = vpack.c.bf16 %v194_v32, %v194_v32  ;;  %v4999_v42 = vld [vmem:[#allocation2 + $0x10c] ss:$16 sps:$4 sm:$0xff]  }
 0x13b   :  { %v5055_v32 = vld [vmem:[#allocation2 + $0x5ec] ss:$16 sps:$4 sm:$0xff]  }
 0x13c   :  { %3050 = vmatpush1.bf16.msra.mxu0 %v4934_v45  ;;  %v1971_v2 = vunpack.c.l.b16 %v302_v63  ;;  %v5059_v63 = vld [vmem:[#allocation2 + $0x5c8] ss:$16 sps:$4 sm:$0xff]  }
 0x13d   :  { %3091 = vmatpush1.bf16.msra.mxu1 %v4937_v46  ;;  %3051 = vmatprep.subr.bf16.mxu0 %v4942_v47  ;;  %v5004_v46 = vld [vmem:[#allocation2 + $0x2ec] ss:$16 sps:$4 sm:$0xff]  }
 0x13e   :  { %3092 = vmatprep.subr.bf16.mxu1 %v4945_v50  ;;  %v1983_v45 = vsel %vm730_vm0, %v1977_v41, %v1971_v2  ;;  %v5007_v47 = vld [vmem:[#allocation2 + $0x4ec] ss:$16 sps:$4 sm:$0xff]   ;;  %v5068_v41 = vld [vmem:[#allocation2 + $0x388] ss:$16 sps:$4 sm:$0xff]  }
 0x13f   :  { %v5523_v50 = vpack.c.b16 %v1983_v45, %v1983_v45  ;;  %v5073_v2 = vld [vmem:[#allocation2 + $0x58c] ss:$16 sps:$4 sm:$0xff]   ;;  %v5077_v45 = vld [vmem:[#allocation2 + $0x568] ss:$16 sps:$4 sm:$0xff]  }
 0x140   :  { %3052 = vmatpush1.bf16.msra.mxu0 %v4940_v49  ;;  %v5010_v49 = vld [vmem:[#allocation2 + $0x2cc] ss:$16 sps:$4 sm:$0xff]  }
 0x141   :  { %3093 = vmatpush1.bf16.msra.mxu1 %v4943_v52  ;;  %3053 = vmatprep.subr.bf16.mxu0 %v4948_v53  ;;  %v5013_v52 = vld [vmem:[#allocation2 + $0x4cc] ss:$16 sps:$4 sm:$0xff]  }
 0x142   :  { %3094 = vmatprep.subr.bf16.mxu1 %v4951_v54 }
 0x144   :  { %3054 = vmatpush1.bf16.msra.mxu0 %v4946_v57  ;;  %v5011_v57 = vld [vmem:[#allocation2 + $0x4c8] ss:$16 sps:$4 sm:$0xff]  }
 0x145   :  { %3095 = vmatpush1.bf16.msra.mxu1 %v4949_v58  ;;  %3055 = vmatprep.subr.bf16.mxu0 %v4954_v59 }
 0x146   :  { %3096 = vmatprep.subr.bf16.mxu1 %v4957_v60  ;;  %v5016_v60 = vld [vmem:[#allocation2 + $0x2ac] ss:$16 sps:$4 sm:$0xff]  }
 0x148   :  { %3056 = vmatpush2.bf16.msra.mxu0 %v4952_v1  ;;  %v5014_v1 = vld [vmem:[#allocation2 + $0x2a8] ss:$16 sps:$4 sm:$0xff]  }
 0x149   :  { %3097 = vmatpush2.bf16.msra.mxu1 %v4955_v4  ;;  %3057 = vmatprep.subr.bf16.mxu0 %v4960_v5  ;;  %v5017_v4 = vld [vmem:[#allocation2 + $0x4a8] ss:$16 sps:$4 sm:$0xff]  }
 0x14a   :  { %3098 = vmatprep.subr.bf16.mxu1 %v4963_v6 }
 0x14c   :  { %3058 = vmatpush2.bf16.msra.mxu0 %v4958_v10  ;;  %v5023_v10 = vld [vmem:[#allocation2 + $0x488] ss:$16 sps:$4 sm:$0xff]  }
 0x14d   :  { %3099 = vmatpush2.bf16.msra.mxu1 %v4961_v13  ;;  %3059 = vmatprep.subr.bf16.mxu0 %v4966_v14  ;;  %v5026_v13 = vld [vmem:[#allocation2 + $0x268] ss:$16 sps:$4 sm:$0xff]  }
 0x14e   :  { %3100 = vmatprep.subr.bf16.mxu1 %v4969_v15  ;;  %v5029_v14 = vld [vmem:[#allocation2 + $0x468] ss:$16 sps:$4 sm:$0xff]   ;;  %v5034_v15 = vld [vmem:[#allocation2 + $0x24c] ss:$16 sps:$4 sm:$0xff]  }
 0x150   :  { %3060 = vmatpush2.bf16.msra.mxu0 %v4964_v16  ;;  %v5037_v16 = vld [vmem:[#allocation2 + $0x44c] ss:$16 sps:$4 sm:$0xff]  }
 0x151   :  { %3101 = vmatpush2.bf16.msra.mxu1 %v4967_v17  ;;  %3061 = vmatprep.subr.bf16.mxu0 %v4972_v19  ;;  %v5032_v17 = vld [vmem:[#allocation2 + $0x248] ss:$16 sps:$4 sm:$0xff]  }
 0x152   :  { %3102 = vmatprep.subr.bf16.mxu1 %v4975_v20  ;;  %v5035_v19 = vld [vmem:[#allocation2 + $0x448] ss:$16 sps:$4 sm:$0xff]   ;;  %v5040_v20 = vld [vmem:[#allocation2 + $0x22c] ss:$16 sps:$4 sm:$0xff]  }
 0x154   :  { %3062 = vmatpush2.bf16.msra.mxu0 %v4970_v24  ;;  %v5043_v24 = vld [vmem:[#allocation2 + $0x42c] ss:$16 sps:$4 sm:$0xff]  }
 0x155   :  { %3103 = vmatpush2.bf16.msra.mxu1 %v4973_v22  ;;  %3063 = vmatprep.subr.bf16.mxu0 %v4978_v21  ;;  %v5038_v22 = vld [vmem:[#allocation2 + $0x228] ss:$16 sps:$4 sm:$0xff]   ;;  %v5049_v21 = vld [vmem:[#allocation2 + $0x40c] ss:$16 sps:$4 sm:$0xff]  }
 0x156   :  { %3104 = vmatprep.subr.bf16.mxu1 %v4981_v28  ;;  %v5044_v28 = vld [vmem:[#allocation2 + $0x208] ss:$16 sps:$4 sm:$0xff]  }
 0x158   :  { %3064 = vmatpush2.bf16.msra.mxu0 %v4976_v30  ;;  %v5047_v30 = vld [vmem:[#allocation2 + $0x408] ss:$16 sps:$4 sm:$0xff]  }
 0x159   :  { %3105 = vmatpush2.bf16.msra.mxu1 %v4979_v31  ;;  %3065 = vmatprep.subr.bf16.mxu0 %v4984_v34  ;;  %v5052_v31 = vld [vmem:[#allocation2 + $0x3ec] ss:$16 sps:$4 sm:$0xff]   ;;  %v5053_v34 = vld [vmem:[#allocation2 + $0x5e8] ss:$16 sps:$4 sm:$0xff]  }
 0x15a   :  { %3106 = vmatprep.subr.bf16.mxu1 %v4987_v35  ;;  %v5058_v35 = vld [vmem:[#allocation2 + $0x3cc] ss:$16 sps:$4 sm:$0xff]  }
 0x15c   :  { %3066 = vmatpush2.bf16.msra.mxu0 %v4982_v36  ;;  %v5061_v36 = vld [vmem:[#allocation2 + $0x5cc] ss:$16 sps:$4 sm:$0xff]  }
 0x15d   :  { %3107 = vmatpush2.bf16.msra.mxu1 %v4985_v62  ;;  %3067 = vmatprep.subr.bf16.mxu0 %v4990_v38  ;;  %v5056_v62 = vld [vmem:[#allocation2 + $0x3c8] ss:$16 sps:$4 sm:$0xff]   ;;  %v5067_v38 = vld [vmem:[#allocation2 + $0x5ac] ss:$16 sps:$4 sm:$0xff]  }
 0x15e   :  { %3108 = vmatprep.subr.bf16.mxu1 %v4993_v39  ;;  %v5062_v39 = vld [vmem:[#allocation2 + $0x3a8] ss:$16 sps:$4 sm:$0xff]  }
 0x160   :  { %3068 = vmatpush2.bf16.msra.mxu0 %v4988_v27  ;;  %v5065_v27 = vld [vmem:[#allocation2 + $0x5a8] ss:$16 sps:$4 sm:$0xff]  }
 0x161   :  { %3109 = vmatpush2.bf16.msra.mxu1 %v4991_v40  ;;  %3069 = vmatprep.subr.bf16.mxu0 %v4996_v3  ;;  %v5070_v40 = vld [vmem:[#allocation2 + $0x38c] ss:$16 sps:$4 sm:$0xff]   ;;  %v5071_v3 = vld [vmem:[#allocation2 + $0x588] ss:$16 sps:$4 sm:$0xff]  }
 0x162   :  { %3110 = vmatprep.subr.bf16.mxu1 %v4999_v42  ;;  %v5076_v42 = vld [vmem:[#allocation2 + $0x36c] ss:$16 sps:$4 sm:$0xff]  }
 0x164   :  { %3070 = vmatpush2.bf16.msra.mxu0 %v4994_v43  ;;  %v5079_v43 = vld [vmem:[#allocation2 + $0x56c] ss:$16 sps:$4 sm:$0xff]  }
 0x165   :  { %3111 = vmatpush2.bf16.msra.mxu1 %v4997_v44  ;;  %3121 = vmatprep.subr.bf16.mxu0 %v5004_v46  ;;  %v5074_v44 = vld [vmem:[#allocation2 + $0x368] ss:$16 sps:$4 sm:$0xff]   ;;  %v5082_v46 = vld [vmem:[#allocation2 + $0x34c] ss:$16 sps:$4 sm:$0xff]  }
 0x166   :  { %3162 = vmatprep.subr.bf16.mxu1 %v5007_v47  ;;  %v5085_v47 = vld [vmem:[#allocation2 + $0x54c] ss:$16 sps:$4 sm:$0xff]  }
 0x167   :  { %v1825_v53 = vpop.f32.mrf.mxu0  ;;  %3072 = vmatmul.mubr.bf16.vlgmr.msra.gmra.mxu0 %v5523_v50 }
 0x168   :  { %v5525_v54 = vpop.f32.mrf.mxu1  ;;  %3113 = vmatmul.mubr.bf16.vlgmr.msra.gmra.mxu1 %v5503_v8  ;;  %v5530_v55 = vadd.f32 %v1825_v53, %v5512_v23  ;;  %3122 = vmatpush1.bf16.msra.mxu0 %v5002_v48  ;;  %v5080_v48 = vld [vmem:[#allocation2 + $0x348] ss:$16 sps:$4 sm:$0xff]  }
 0x169   :  { %3163 = vmatpush1.bf16.msra.mxu1 %v5005_v51  ;;  %v1827_v58 = vpop.f32.mrf.mxu0  ;;  %3123 = vmatprep.subr.bf16.mxu0 %v5010_v49  ;;  %v5083_v51 = vld [vmem:[#allocation2 + $0x548] ss:$16 sps:$4 sm:$0xff]   ;;  %v5088_v49 = vld [vmem:[#allocation2 + $0x32c] ss:$16 sps:$4 sm:$0xff]  }
 0x16a   :  { %v5532_v59 = vpop.f32.mrf.mxu1  ;;  %3164 = vmatprep.subr.bf16.mxu1 %v5013_v52  ;;  %v5535_v0 = vadd.f32 %v1827_v58, %v5514_v29  ;;  %3153 = vmatprep.mubr.bf16.mxu0 %v5473_v12  ;;  %v5020_v29 = vld [vmem:[#allocation2 + $0x288] ss:$16 sps:$4 sm:$0xff]   ;;  %v5028_v12 = vld [vmem:[#allocation2 + $0x26c] ss:$16 sps:$4 sm:$0xff]  }
 0x16b   :  { %3194 = vmatprep.mubr.bf16.mxu1 %v5508_v18  ;;  %v1829_v8 = vpop.f32.mrf.mxu0  ;;  %v5031_v18 = vld [vmem:[#allocation2 + $0x46c] ss:$16 sps:$4 sm:$0xff]   ;;  %v5086_v53 = vld [vmem:[#allocation2 + $0x328] ss:$16 sps:$4 sm:$0xff]  }
 0x16c   :  { %v1870_v23 = vpop.f32.mrf.mxu1  ;;  %3124 = vmatpush1.bf16.msra.mxu0 %v5008_v56  ;;  %v5091_v52 = vld [vmem:[#allocation2 + $0x52c] ss:$16 sps:$4 sm:$0xff]   ;;  %v5089_v56 = vld [vmem:[#allocation2 + $0x528] ss:$16 sps:$4 sm:$0xff]  }
 0x16d   :  { %3165 = vmatpush1.bf16.msra.mxu1 %v5011_v57  ;;  %v1830_v5 = vpop.f32.mrf.mxu0  ;;  %3125 = vmatprep.subr.bf16.mxu0 %v5016_v60  ;;  %v5094_v57 = vld [vmem:[#allocation2 + $0x30c] ss:$16 sps:$4 sm:$0xff]   ;;  %v5092_v60 = vld [vmem:[#allocation2 + $0x308] ss:$16 sps:$4 sm:$0xff]  }
 0x16e   :  { %v1871_v6 = vpop.f32.mrf.mxu1  ;;  %3166 = vmatprep.subr.bf16.mxu1 %v5019_v61  ;;  %v5097_v58 = vld [vmem:[#allocation2 + $0x50c] ss:$16 sps:$4 sm:$0xff]   ;;  %v5095_v61 = vld [vmem:[#allocation2 + $0x508] ss:$16 sps:$4 sm:$0xff]  }
 0x16f   :  { %v5100_v8 = vld [vmem:[#allocation7 + $0x74] ss:$8 sps:$4 sm:$0xff]   ;;  %v5098_v23 = vld [vmem:[#allocation7 + $0x70] ss:$8 sps:$4 sm:$0xff]  }
 0x170   :  { %3126 = vmatpush1.bf16.msra.mxu0 %v5014_v1  ;;  %v5103_v1 = vld [vmem:[#allocation7 + $0x64] ss:$8 sps:$4 sm:$0xff]  }
 0x171   :  { %3167 = vmatpush1.bf16.msra.mxu1 %v5017_v4  ;;  %3127 = vmatprep.subr.bf16.mxu0 %v5022_v7  ;;  %v5101_v7 = vld [vmem:[#allocation7 + $0x60] ss:$8 sps:$4 sm:$0xff]  }
 0x172   :  { %3168 = vmatprep.subr.bf16.mxu1 %v5025_v9 }
 0x174   :  { %3128 = vmatpush1.bf16.msra.mxu0 %v5020_v29 }
 0x175   :  { %3169 = vmatpush1.bf16.msra.mxu1 %v5023_v10  ;;  %3129 = vmatprep.subr.bf16.mxu0 %v5028_v12  ;;  %v5106_v10 = vld [vmem:[#allocation7 + $0x54] ss:$8 sps:$4 sm:$0xff]  }
 0x176   :  { %3170 = vmatprep.subr.bf16.mxu1 %v5031_v18 }
 0x178   :  { %3130 = vmatpush1.bf16.msra.mxu0 %v5026_v13 }
 0x179   :  { %3171 = vmatpush1.bf16.msra.mxu1 %v5029_v14  ;;  %3131 = vmatprep.subr.bf16.mxu0 %v5034_v15 }
 0x17a   :  { %3172 = vmatprep.subr.bf16.mxu1 %v5037_v16 }
 0x17c   :  { %3132 = vmatpush1.bf16.msra.mxu0 %v5032_v17  ;;  %v5107_v17 = vld [vmem:[#allocation7 + $0x40] ss:$8 sps:$4 sm:$0xff]  }
 0x17d   :  { %3173 = vmatpush1.bf16.msra.mxu1 %v5035_v19  ;;  %3133 = vmatprep.subr.bf16.mxu0 %v5040_v20  ;;  %v5112_v19 = vld [vmem:[#allocation7 + $0x34] ss:$8 sps:$4 sm:$0xff]   ;;  %v5146_v20 = vld [vmem:[#allocation7 + $0x170] ss:$8 sps:$4 sm:$0xff]  }
 0x17e   :  { %3174 = vmatprep.subr.bf16.mxu1 %v5043_v24  ;;  %v5148_v24 = vld [vmem:[#allocation7 + $0x174] ss:$8 sps:$4 sm:$0xff]  }
 0x180   :  { %3134 = vmatpush1.bf16.msra.mxu0 %v5038_v22  ;;  %v5110_v22 = vld [vmem:[#allocation7 + $0x30] ss:$8 sps:$4 sm:$0xff]  }
 0x181   :  { %3175 = vmatpush1.bf16.msra.mxu1 %v5041_v25  ;;  %3135 = vmatprep.subr.bf16.mxu0 %v5046_v26  ;;  %v5151_v25 = vld [vmem:[#allocation7 + $0x164] ss:$8 sps:$4 sm:$0xff]   ;;  %v5149_v26 = vld [vmem:[#allocation7 + $0x160] ss:$8 sps:$4 sm:$0xff]  }
 0x182   :  { %3176 = vmatprep.subr.bf16.mxu1 %v5049_v21  ;;  %v5154_v21 = vld [vmem:[#allocation7 + $0x154] ss:$8 sps:$4 sm:$0xff]  }
 0x184   :  { %3136 = vmatpush1.bf16.msra.mxu0 %v5044_v28  ;;  %v5113_v28 = vld [vmem:[#allocation7 + $0x20] ss:$8 sps:$4 sm:$0xff]  }
 0x185   :  { %3177 = vmatpush1.bf16.msra.mxu1 %v5047_v30  ;;  %3137 = vmatprep.subr.bf16.mxu0 %v5052_v31  ;;  %v5118_v30 = vld [vmem:[#allocation7 + $0x14] ss:$8 sps:$4 sm:$0xff]   ;;  %v5152_v31 = vld [vmem:[#allocation7 + $0x150] ss:$8 sps:$4 sm:$0xff]  }
 0x186   :  { %3178 = vmatprep.subr.bf16.mxu1 %v5055_v32  ;;  %v5157_v32 = vld [vmem:[#allocation7 + $0x144] ss:$8 sps:$4 sm:$0xff]  }
 0x188   :  { %3138 = vmatpush2.bf16.msra.mxu0 %v5050_v33  ;;  %v5116_v33 = vld [vmem:[#allocation7 + $0x10] ss:$8 sps:$4 sm:$0xff]  }
 0x189   :  { %3179 = vmatpush2.bf16.msra.mxu1 %v5053_v34  ;;  %3139 = vmatprep.subr.bf16.mxu0 %v5058_v35  ;;  %v5121_v34 = vld [vmem:[#allocation7 + $0x4] ss:$8 sps:$4 sm:$0xff]   ;;  %v5155_v35 = vld [vmem:[#allocation7 + $0x140] ss:$8 sps:$4 sm:$0xff]  }
 0x18a   :  { %3180 = vmatprep.subr.bf16.mxu1 %v5061_v36  ;;  %v5160_v36 = vld [vmem:[#allocation7 + $0x134] ss:$8 sps:$4 sm:$0xff]  }
 0x18c   :  { %3140 = vmatpush2.bf16.msra.mxu0 %v5056_v62  ;;  %v5119_v62 = vld [vmem:[#allocation7] ss:$8 sps:$4 sm:$0xff]  }
 0x18d   :  { %3181 = vmatpush2.bf16.msra.mxu1 %v5059_v63  ;;  %3141 = vmatprep.subr.bf16.mxu0 %v5064_v37  ;;  %v5124_v63 = vld [vmem:[#allocation7 + $0xf4] ss:$8 sps:$4 sm:$0xff]   ;;  %v5158_v37 = vld [vmem:[#allocation7 + $0x130] ss:$8 sps:$4 sm:$0xff]  }
 0x18e   :  { %3182 = vmatprep.subr.bf16.mxu1 %v5067_v38  ;;  %v5163_v38 = vld [vmem:[#allocation7 + $0x124] ss:$8 sps:$4 sm:$0xff]  }
 0x190   :  { %3142 = vmatpush2.bf16.msra.mxu0 %v5062_v39  ;;  %v5122_v39 = vld [vmem:[#allocation7 + $0xf0] ss:$8 sps:$4 sm:$0xff]  }
 0x191   :  { %3183 = vmatpush2.bf16.msra.mxu1 %v5065_v27  ;;  %3143 = vmatprep.subr.bf16.mxu0 %v5070_v40  ;;  %v5127_v27 = vld [vmem:[#allocation7 + $0xe4] ss:$8 sps:$4 sm:$0xff]   ;;  %v5161_v40 = vld [vmem:[#allocation7 + $0x120] ss:$8 sps:$4 sm:$0xff]  }
 0x192   :  { %3184 = vmatprep.subr.bf16.mxu1 %v5073_v2  ;;  %v5166_v2 = vld [vmem:[#allocation7 + $0x114] ss:$8 sps:$4 sm:$0xff]  }
 0x194   :  { %3144 = vmatpush2.bf16.msra.mxu0 %v5068_v41  ;;  %v5125_v41 = vld [vmem:[#allocation7 + $0xe0] ss:$8 sps:$4 sm:$0xff]  }
 0x195   :  { %3185 = vmatpush2.bf16.msra.mxu1 %v5071_v3  ;;  %3145 = vmatprep.subr.bf16.mxu0 %v5076_v42  ;;  %v5130_v3 = vld [vmem:[#allocation7 + $0xd4] ss:$8 sps:$4 sm:$0xff]   ;;  %v5164_v42 = vld [vmem:[#allocation7 + $0x110] ss:$8 sps:$4 sm:$0xff]  }
 0x196   :  { %3186 = vmatprep.subr.bf16.mxu1 %v5079_v43  ;;  %v5169_v43 = vld [vmem:[#allocation7 + $0x104] ss:$8 sps:$4 sm:$0xff]  }
 0x198   :  { %3146 = vmatpush2.bf16.msra.mxu0 %v5074_v44  ;;  %v5128_v44 = vld [vmem:[#allocation7 + $0xd0] ss:$8 sps:$4 sm:$0xff]  }
 0x199   :  { %3187 = vmatpush2.bf16.msra.mxu1 %v5077_v45  ;;  %3147 = vmatprep.subr.bf16.mxu0 %v5082_v46  ;;  %v5133_v45 = vld [vmem:[#allocation7 + $0xc4] ss:$8 sps:$4 sm:$0xff]   ;;  %v5167_v46 = vld [vmem:[#allocation7 + $0x100] ss:$8 sps:$4 sm:$0xff]  }
 0x19a   :  { %3188 = vmatprep.subr.bf16.mxu1 %v5085_v47  ;;  %v5172_v47 = vld [vmem:[#allocation7 + $0x1f4] ss:$8 sps:$4 sm:$0xff]  }
 0x19c   :  { %3148 = vmatpush2.bf16.msra.mxu0 %v5080_v48  ;;  %v5131_v48 = vld [vmem:[#allocation7 + $0xc0] ss:$8 sps:$4 sm:$0xff]  }
 0x19d   :  { %3189 = vmatpush2.bf16.msra.mxu1 %v5083_v51  ;;  %3149 = vmatprep.subr.bf16.mxu0 %v5088_v49  ;;  %v5136_v51 = vld [vmem:[#allocation7 + $0xb4] ss:$8 sps:$4 sm:$0xff]   ;;  %v5170_v49 = vld [vmem:[#allocation7 + $0x1f0] ss:$8 sps:$4 sm:$0xff]  }
 0x19e   :  { %3190 = vmatprep.subr.bf16.mxu1 %v5091_v52  ;;  %v5175_v52 = vld [vmem:[#allocation7 + $0x1e4] ss:$8 sps:$4 sm:$0xff]  }
 0x1a0   :  { %3150 = vmatpush2.bf16.msra.mxu0 %v5086_v53  ;;  %v5134_v53 = vld [vmem:[#allocation7 + $0xb0] ss:$8 sps:$4 sm:$0xff]  }
 0x1a1   :  { %3191 = vmatpush2.bf16.msra.mxu1 %v5089_v56  ;;  %3151 = vmatprep.subr.bf16.mxu0 %v5094_v57  ;;  %v5139_v56 = vld [vmem:[#allocation7 + $0xa4] ss:$8 sps:$4 sm:$0xff]   ;;  %v5173_v57 = vld [vmem:[#allocation7 + $0x1e0] ss:$8 sps:$4 sm:$0xff]  }
 0x1a2   :  { %3192 = vmatprep.subr.bf16.mxu1 %v5097_v58  ;;  %v5178_v58 = vld [vmem:[#allocation7 + $0x1d4] ss:$8 sps:$4 sm:$0xff]  }
 0x1a4   :  { %3152 = vmatpush2.bf16.msra.mxu0 %v5092_v60  ;;  %v5137_v60 = vld [vmem:[#allocation7 + $0xa0] ss:$8 sps:$4 sm:$0xff]  }
 0x1a5   :  { %3193 = vmatpush2.bf16.msra.mxu1 %v5095_v61  ;;  %3633 = vmatprep.subr.bf16.mxu0 %v5100_v8  ;;  %v5142_v61 = vld [vmem:[#allocation7 + $0x94] ss:$8 sps:$4 sm:$0xff]   ;;  %v5176_v8 = vld [vmem:[#allocation7 + $0x1d0] ss:$8 sps:$4 sm:$0xff]  }
 0x1a6   :  { %3674 = vmatprep.subr.bf16.mxu1 %v5148_v24 }
 0x1a7   :  { %v1907_v4 = vpop.f32.mrf.mxu0  ;;  %3154 = vmatmul.mubr.bf16.vlgmr.msra.gmra.mxu0 %v5505_v11  ;;  %v5104_v11 = vld [vmem:[#allocation7 + $0x50] ss:$8 sps:$4 sm:$0xff]  }
 0x1a8   :  { %v1948_v5 = vpop.f32.mrf.mxu1  ;;  %3195 = vmatmul.mubr.bf16.vlgmr.msra.gmra.mxu1 %v5523_v50  ;;  %v1908_v6 = vadd.f32 %v1907_v4, %v5525_v54  ;;  %3634 = vmatpush1.bf16.msra.mxu0 %v5098_v23  ;;  %v5109_v54 = vld [vmem:[#allocation7 + $0x44] ss:$8 sps:$4 sm:$0xff]  }
 0x1a9   :  { %v1909_v9 = vpop.f32.mrf.mxu0  ;;  %3635 = vmatprep.subr.bf16.mxu0 %v5103_v1  ;;  %3675 = vmatpush1.bf16.msra.mxu1 %v5146_v20  ;;  %v5181_v23 = vld [vmem:[#allocation7 + $0x1c4] ss:$8 sps:$4 sm:$0xff]   ;;  %v5140_v1 = vld [vmem:[#allocation7 + $0x90] ss:$8 sps:$4 sm:$0xff]  }
 0x1aa   :  { %v1950_v29 = vpop.f32.mrf.mxu1  ;;  %v5542_v12 = vadd.f32 %v1948_v5, %v1908_v6  ;;  %v1910_v18 = vadd.f32 %v1909_v9, %v5532_v59  ;;  %v5115_v59 = vld [vmem:[#allocation7 + $0x24] ss:$8 sps:$4 sm:$0xff]   ;;  %3676 = vmatprep.subr.bf16.mxu1 %v5151_v25  ;;  %v5179_v5 = vld [vmem:[#allocation7 + $0x1c0] ss:$8 sps:$4 sm:$0xff]   ;;  %v5184_v6 = vld [vmem:[#allocation7 + $0x1b4] ss:$8 sps:$4 sm:$0xff]  }
 0x1ab   :  { %v1911_v13 = vpop.f32.mrf.mxu0  ;;  %v5145_v4 = vld [vmem:[#allocation7 + $0x84] ss:$8 sps:$4 sm:$0xff]   ;;  %v5182_v9 = vld [vmem:[#allocation7 + $0x1b0] ss:$8 sps:$4 sm:$0xff]  }
 0x1ac   :  { %v1952_v14 = vpop.f32.mrf.mxu1  ;;  %v5545_v15 = vadd.f32 %v1950_v29, %v1910_v18  ;;  %3636 = vmatpush1.bf16.msra.mxu0 %v5101_v7  ;;  %v5143_v7 = vld [vmem:[#allocation7 + $0x80] ss:$8 sps:$4 sm:$0xff]   ;;  %v5187_v18 = vld [vmem:[#allocation7 + $0x1a4] ss:$8 sps:$4 sm:$0xff]   ;;  %v5188_v20 = vld [vmem:[#allocation7 + $0x190] ss:$8 sps:$4 sm:$0xff]  }
 0x1ad   :  { %v1912_v16 = vpop.f32.mrf.mxu0  ;;  %3637 = vmatprep.subr.bf16.mxu0 %v5106_v10  ;;  %3677 = vmatpush1.bf16.msra.mxu1 %v5149_v26  ;;  %v5185_v14 = vld [vmem:[#allocation7 + $0x1a0] ss:$8 sps:$4 sm:$0xff]   ;;  %v5193_v25 = vld [vmem:[#allocation7 + $0x184] ss:$8 sps:$4 sm:$0xff]   ;;  %v3205_v26 = vlaneseq }
 0x1ae   :  { %v1953_v50 = vpop.f32.mrf.mxu1  ;;  %3678 = vmatprep.subr.bf16.mxu1 %v5154_v21 }
 0x1b0   :  { %3638 = vmatpush1.bf16.msra.mxu0 %v5104_v11 }
 0x1b1   :  { %3639 = vmatprep.subr.bf16.mxu0 %v5109_v54  ;;  %3679 = vmatpush1.bf16.msra.mxu1 %v5152_v31 }
 0x1b2   :  { %3680 = vmatprep.subr.bf16.mxu1 %v5157_v32 }
 0x1b4   :  { %3640 = vmatpush1.bf16.msra.mxu0 %v5107_v17 }
 0x1b5   :  { %3641 = vmatprep.subr.bf16.mxu0 %v5112_v19  ;;  %3681 = vmatpush1.bf16.msra.mxu1 %v5155_v35  ;;  %v5190_v19 = vld [vmem:[#allocation7 + $0x194] ss:$8 sps:$4 sm:$0xff]  }
 0x1b6   :  { %3682 = vmatprep.subr.bf16.mxu1 %v5160_v36 }
 0x1b8   :  { %3642 = vmatpush1.bf16.msra.mxu0 %v5110_v22 }
 0x1b9   :  { %3643 = vmatprep.subr.bf16.mxu0 %v5115_v59  ;;  %3683 = vmatpush1.bf16.msra.mxu1 %v5158_v37  ;;  %v5191_v59 = vld [vmem:[#allocation7 + $0x180] ss:$8 sps:$4 sm:$0xff]  }
 0x1ba   :  { %3684 = vmatprep.subr.bf16.mxu1 %v5163_v38 }
 0x1bc   :  { %3644 = vmatpush1.bf16.msra.mxu0 %v5113_v28  ;;  %v3203_v28 = vld [vmem:[%s5644_s4] sm:$0xf] }
 0x1bd   :  { %3645 = vmatprep.subr.bf16.mxu0 %v5118_v30  ;;  %3685 = vmatpush1.bf16.msra.mxu1 %v5161_v40 }
 0x1be   :  { %3686 = vmatprep.subr.bf16.mxu1 %v5166_v2 }
 0x1c0   :  { %3646 = vmatpush1.bf16.msra.mxu0 %v5116_v33 }
 0x1c1   :  { %3647 = vmatprep.subr.bf16.mxu0 %v5121_v34  ;;  %3687 = vmatpush1.bf16.msra.mxu1 %v5164_v42 }
 0x1c2   :  { %3688 = vmatprep.subr.bf16.mxu1 %v5169_v43 }
 0x1c4   :  { %3648 = vmatpush1.bf16.msra.mxu0 %v5119_v62 }
 0x1c5   :  { %3649 = vmatprep.subr.bf16.mxu0 %v5124_v63  ;;  %3689 = vmatpush1.bf16.msra.mxu1 %v5167_v46 }
 0x1c6   :  { %3690 = vmatprep.subr.bf16.mxu1 %v5172_v47 }
 0x1c8   :  { %3650 = vmatpush2.bf16.msra.mxu0 %v5122_v39 }
 0x1c9   :  { %3651 = vmatprep.subr.bf16.mxu0 %v5127_v27  ;;  %3691 = vmatpush2.bf16.msra.mxu1 %v5170_v49 }
 0x1ca   :  { %3692 = vmatprep.subr.bf16.mxu1 %v5175_v52 }
 0x1cc   :  { %3652 = vmatpush2.bf16.msra.mxu0 %v5125_v41 }
 0x1cd   :  { %3653 = vmatprep.subr.bf16.mxu0 %v5130_v3  ;;  %3693 = vmatpush2.bf16.msra.mxu1 %v5173_v57 }
 0x1ce   :  { %3694 = vmatprep.subr.bf16.mxu1 %v5178_v58 }
 0x1d0   :  { %3654 = vmatpush2.bf16.msra.mxu0 %v5128_v44 }
 0x1d1   :  { %3655 = vmatprep.subr.bf16.mxu0 %v5133_v45  ;;  %3695 = vmatpush2.bf16.msra.mxu1 %v5176_v8 }
 0x1d2   :  { %3696 = vmatprep.subr.bf16.mxu1 %v5181_v23 }
 0x1d4   :  { %3656 = vmatpush2.bf16.msra.mxu0 %v5131_v48 }
 0x1d5   :  { %3657 = vmatprep.subr.bf16.mxu0 %v5136_v51  ;;  %3697 = vmatpush2.bf16.msra.mxu1 %v5179_v5 }
 0x1d6   :  { %3698 = vmatprep.subr.bf16.mxu1 %v5184_v6 }
 0x1d8   :  { %3658 = vmatpush2.bf16.msra.mxu0 %v5134_v53 }
 0x1d9   :  { %3659 = vmatprep.subr.bf16.mxu0 %v5139_v56  ;;  %3699 = vmatpush2.bf16.msra.mxu1 %v5182_v9 }
 0x1da   :  { %3700 = vmatprep.subr.bf16.mxu1 %v5187_v18  ;;  %v5195_v18 = vld [vmem:[%s5647_s7 + $0x38] sm:$0xff]  }
 0x1dc   :  { %3660 = vmatpush2.bf16.msra.mxu0 %v5137_v60 }
 0x1dd   :  { %3661 = vmatprep.subr.bf16.mxu0 %v5142_v61  ;;  %3701 = vmatpush2.bf16.msra.mxu1 %v5185_v14  ;;  %v5197_v14 = vld [vmem:[%s5647_s7 + $0x30] sm:$0xff]  }
 0x1de   :  { %3702 = vmatprep.subr.bf16.mxu1 %v5190_v19  ;;  %v5203_v19 = vld [vmem:[%s5647_s7 + $0x18] sm:$0xff]  }
 0x1e0   :  { %3662 = vmatpush2.bf16.msra.mxu0 %v5140_v1 }
 0x1e1   :  { %3663 = vmatprep.subr.bf16.mxu0 %v5145_v4  ;;  %3703 = vmatpush2.bf16.msra.mxu1 %v5188_v20  ;;  %v5204_v20 = vld [vmem:[%s5647_s7 + $0x50] sm:$0xff]  }
 0x1e2   :  { %3704 = vmatprep.subr.bf16.mxu1 %v5193_v25  ;;  %v5207_v25 = vld [vmem:[%s5647_s7 + $0x8] sm:$0xff]  }
 0x1e4   :  { %3664 = vmatpush2.bf16.msra.mxu0 %v5143_v7 }
 0x1e5   :  { %3705 = vmatpush2.bf16.msra.mxu1 %v5191_v59  ;;  %v5208_v59 = vld [vmem:[%s5647_s7 + $0x40] sm:$0xff]  }
 0x1e7   :  { %v2991_v29 = vpop.f32.mrf.mxu0 }
 0x1e8   :  { %v3032_v10 = vpop.f32.mrf.mxu1  ;;  %v2992_v13 = vadd.f32 %v2991_v29, %v5530_v55  ;;  %v5548_v55 = vshrl.u32 %v3205_v26, 7  ;;  %v5209_v26 = vld [vmem:[%s5647_s7] sm:$0xff]  }
 0x1e9   :  { %v2993_v11 = vpop.f32.mrf.mxu0 }
 0x1ea   :  { %v3034_v16 = vpop.f32.mrf.mxu1  ;;  %v3033_v50 = vadd.f32 %v3032_v10, %v2992_v13  ;;  %v3207_v21 = vsub.s32 0, %v5548_v55  ;;  %v2994_v30 = vadd.f32 %v2993_v11, %v5535_v0  ;;  %v3211_v31 = vsub.s32 1, %v5548_v55  ;;  %v5196_v13 = vld [vmem:[%s5647_s7 + $0x70] sm:$0xff]   ;;  %v5198_v11 = vld [vmem:[%s5647_s7 + $0x68] sm:$0xff]  }
 0x1eb   :  { %v2995_v54 = vpop.f32.mrf.mxu0  ;;  %v3219_v46 = vsub.s32 3, %v5548_v55 }
 0x1ec   :  { %v3036_v17 = vpop.f32.mrf.mxu1  ;;  %v3208_v32 = vrot.slane %v3203_v28, %v3207_v21  ;;  %v3035_v35 = vadd.f32 %v3034_v16, %v2994_v30  ;;  %v3212_v63 = vrot.slane %v3203_v28, %v3211_v31  ;;  %v5199_v16 = vld [vmem:[%s5647_s7 + $0x28] sm:$0xff]   ;;  %v5201_v54 = vld [vmem:[%s5647_s7 + $0x20] sm:$0xff]   ;;  %v5307_v30 = vmov 0.0  }
 0x1ed   :  { %v2996_v24 = vpop.f32.mrf.mxu0  ;;  %v3220_v60 = vrot.slane %v3203_v28, %v3219_v46  ;;  %v5202_v17 = vld [vmem:[%s5647_s7 + $0x58] sm:$0xff]   ;;  %4494 = vmatprep.subr.bf16.mxu1 %v5307_v30 }
 0x1ee   :  { %v3037_v22 = vpop.f32.mrf.mxu1  ;;  %v5205_v24 = vld [vmem:[%s5647_s7 + $0x10] sm:$0xff]  }
 0x1ef   :  { %v5206_v22 = vld [vmem:[%s5647_s7 + $0x48] sm:$0xff]  }
 0x227   :  { %v3073_v33 = vpop.f32.mrf.mxu0 }
 0x228   :  { %v3114_v34 = vpop.f32.mrf.mxu1  ;;  %v3074_v36 = vadd.f32 %v3073_v33, %v3033_v50  ;;  %v5200_v50 = vld [vmem:[%s5647_s7 + $0x60] sm:$0xff]  }
 0x229   :  { %v3115_v62 = vadd.f32 %v3114_v34, %v5542_v12  ;;  %v3075_v37 = vpop.f32.mrf.mxu0  ;;  %v3215_v12 = vsub.s32 2, %v5548_v55  ;;  %v5212_v55 = vld [vmem:[%s5649_s9 + $0x8] sm:$0xff]  }
 0x22a   :  { %v3116_v38 = vpop.f32.mrf.mxu1  ;;  %v3225_v39 = vadd.f32 %v3208_v32, %v3074_v36  ;;  %v3076_v27 = vadd.f32 %v3075_v37, %v3035_v35  ;;  %v3301_v36 = vld [vmem:[%s5646_s6] sm:$0x3] }
 0x22b   :  { %v3077_v40 = vpop.f32.mrf.mxu0  ;;  %v3117_v51 = vadd.f32 %v3116_v38, %v5545_v15  ;;  %v3216_v52 = vrot.slane %v3203_v28, %v3215_v12  ;;  %v5194_v15 = vld [vmem:[%s5647_s7 + $0x78] sm:$0xff]   ;;  %v4444_v12 = vld [vmem:[%s5648_s8] ss:$0 sm:$0xff] }
 0x22c   :  { %v3118_v0 = vpop.f32.mrf.mxu1  ;;  %v3226_v2 = vadd.f32 %v3212_v63, %v3076_v27  ;;  %v3229_v41 = vmax.f32 %v3225_v39, 0.0  ;;  %4467 = vmatprep.subr.bf16.mxu0 %v5194_v15  ;;  %v5210_v28 = vld [vmem:[%s5649_s9 + $0x18] sm:$0xff]   ;;  %v3310_v63 = vrot.slane %v3301_v36, %v3211_v31  ;;  %v5213_v31 = vld [vmem:[%s5649_s9] sm:$0xff]  }
 0x22d   :  { %v3078_v3 = vpop.f32.mrf.mxu0 }
 0x22e   :  { %v3119_v42 = vpop.f32.mrf.mxu1  ;;  %v3230_v43 = vmax.f32 %v3226_v2, 0.0  ;;  %v3233_v45 = vpack.c.bf16 %v3229_v41, %v3229_v41 }
 0x230   :  { %v3234_v44 = vpack.c.bf16 %v3230_v43, %v3230_v43 }
 0x232   :  { %3665 = vmatprep.mubr.bf16.mxu0 %v3234_v44 }
 0x233   :  { %3666 = vmatmul.mubr.bf16.vlgmr.msra.gmra.mxu0 %v3233_v45 }
 0x234   :  { %4468 = vmatpush3.bf16.msra.mxu0 %v5195_v18 }
 0x235   :  { %4469 = vmatprep.subr.bf16.mxu0 %v5196_v13 }
 0x238   :  { %4470 = vmatpush3.bf16.msra.mxu0 %v5197_v14 }
 0x239   :  { %4471 = vmatprep.subr.bf16.mxu0 %v5198_v11 }
 0x23c   :  { %4472 = vmatpush3.bf16.msra.mxu0 %v5199_v16 }
 0x23d   :  { %4473 = vmatprep.subr.bf16.mxu0 %v5200_v50 }
 0x240   :  { %4474 = vmatpush3.bf16.msra.mxu0 %v5201_v54 }
 0x241   :  { %4475 = vmatprep.subr.bf16.mxu0 %v5202_v17 }
 0x244   :  { %4476 = vmatpush3.bf16.msra.mxu0 %v5203_v19 }
 0x245   :  { %4477 = vmatprep.subr.bf16.mxu0 %v5204_v20 }
 0x248   :  { %4478 = vmatpush3.bf16.msra.mxu0 %v5205_v24 }
 0x249   :  { %4479 = vmatprep.subr.bf16.mxu0 %v5206_v22 }
 0x24c   :  { %4480 = vmatpush3.bf16.msra.mxu0 %v5207_v25 }
 0x24d   :  { %4481 = vmatprep.subr.bf16.mxu0 %v5208_v59 }
 0x250   :  { %4482 = vmatpush3.bf16.msra.mxu0 %v5209_v26 }
 0x267   :  { %v3155_v47 = vpop.f32.mrf.mxu0 }
 0x268   :  { %v3196_v48 = vpop.f32.mrf.mxu1  ;;  %v3156_v49 = vadd.f32 %v3155_v47, %v3115_v62  ;;  %v3306_v62 = vrot.slane %v3301_v36, %v3207_v21  ;;  %v5211_v21 = vld [vmem:[%s5649_s9 + $0x10] sm:$0xff]   ;;  %s5309_s9 = smov [#allocation8]  }
 0x269   :  { %v3157_v53 = vpop.f32.mrf.mxu0  ;;  %s3986_s23 = sshll.u32 %s5309_s9, 4  ;;  %s3987_s23 = int_to_ptr.vmem [resolvable:$true] %s3986_s23 }
 0x26a   :  { %v3198_v56 = vpop.f32.mrf.mxu1  ;;  %v3197_v57 = vadd.f32 %v3196_v48, %v3156_v49  ;;  %v3158_v58 = vadd.f32 %v3157_v53, %v3117_v51  ;;  %s5274_s8 = scalar_lea.vmem %s3987_s23, 32  ;;  %p5279_p2 = scmp.lt.s32.totalorder %s3987_s23, %s3987_s23 }
 0x26b   :  { %v3159_v61 = vpop.f32.mrf.mxu0  ;;  %p5275_p1 = scmp.ne.s32.totalorder %s3987_s23, %s5274_s8  ;;  %p5280_p3 = scmp.lt.s32.totalorder %s5274_s8, %s5274_s8 }
 0x26c   :  { %v3200_v8 = vpop.f32.mrf.mxu1  ;;  %v3227_v23 = vadd.f32 %v3216_v52, %v3197_v57  ;;  %v3199_v1 = vadd.f32 %v3198_v56, %v3158_v58  ;;  %v4461_v56 = vld [vmem:[%s5650_s10] ss:$0 sm:$0xff] }
 0x26d   :  { %v3160_v4 = vpop.f32.mrf.mxu0  ;;  %p5281_p4 = por %p5280_p3, %p5279_p2 }
 0x26e   :  { %v3201_v5 = vpop.f32.mrf.mxu1  ;;  %v3228_v6 = vadd.f32 %v3220_v60, %v3199_v1  ;;  %v3231_v7 = vmax.f32 %v3227_v23, 0.0 }
 0x26f   :  { %p5282_p5 = pnand %p5281_p4, %p5275_p1 }
 0x270   :  { %v3232_v9 = vmax.f32 %v3228_v6, 0.0  ;;  %v3235_v10 = vpack.c.bf16 %v3231_v7, %v3231_v7 }
 0x272   :  { %v3236_v29 = vpack.c.bf16 %v3232_v9, %v3232_v9 }
 0x274   :  { %3706 = vmatprep.mubr.bf16.mxu1 %v3236_v29 }
 0x275   :  { %3707 = vmatmul.mubr.bf16.vlgmr.msra.gmra.mxu1 %v3235_v10 }
 0x276   :  { %4495 = vmatpush3.bf16.msra.mxu1 %v5210_v28  ;;  %4502 = vmatprep.mubr.msk.bf16.mxu1 %vm5308_vm2, %v5307_v30 }
 0x277   :  { %4496 = vmatprep.subr.bf16.mxu1 %v5307_v30 }
 0x27a   :  { %4497 = vmatpush3.bf16.msra.mxu1 %v5211_v21 }
 0x27b   :  { %4498 = vmatprep.subr.bf16.mxu1 %v5307_v30 }
 0x27e   :  { %4499 = vmatpush3.bf16.msra.mxu1 %v5212_v55 }
 0x27f   :  { %4500 = vmatprep.subr.bf16.mxu1 %v5307_v30 }
 0x282   :  { %4501 = vmatpush3.bf16.msra.mxu1 %v5213_v31 }
 0x2f3   :  { %v3667_v32 = vpop.f32.mrf.mxu0 }
 0x2f4   :  { %v3668_v37 = vadd.f32 %v3667_v32, %v3306_v62 }
 0x2f5   :  { %v3669_v33 = vpop.f32.mrf.mxu0 }
 0x2f6   :  { %v3670_v39 = vadd.f32 %v3669_v33, %v3310_v63 }
 0x2f7   :  { %v3671_v34 = vpop.f32.mrf.mxu0 }
 0x2f9   :  { %v3672_v35 = vpop.f32.mrf.mxu0 }
 0x335   :  { %v3708_v38 = vpop.f32.mrf.mxu1 }
 0x336   :  { %v3709_v27 = vadd.f32 %v3708_v38, %v3668_v37 }
 0x337   :  { %v3710_v40 = vpop.f32.mrf.mxu1 }
 0x338   :  { %v3711_v0 = vadd.f32 %v3710_v40, %v3670_v39  ;;  %v3715_v2 = vmax.f32 %v3709_v27, 0.0 }
 0x339   :  { %v3712_v41 = vpop.f32.mrf.mxu1 }
 0x33a   :  { %v3716_v3 = vmax.f32 %v3711_v0, 0.0  ;;  %v3717_v44 = vpack.c.bf16 %v3715_v2, %v3715_v2 }
 0x33b   :  { %v3713_v42 = vpop.f32.mrf.mxu1 }
 0x33c   :  { %v3718_v43 = vpack.c.bf16 %v3716_v3, %v3716_v3 }
 0x33e   :  { %3886 = vmatprep.mubr.bf16.mxu0 %v3718_v43 }
 0x33f   :  { %3887 = vmatmul.mubr.bf16.vlgmr.msra.gmra.mxu0 %v3717_v44 }
 0x3ff   :  { %v4483_v45 = vpop.f32.mrf.mxu0 }
 0x401   :  { %v4484_v46 = vpop.f32.mrf.mxu0 }
 0x402   :  { %v4485_v47 = vadd.f32 %v4484_v46, %v4483_v45 }
 0x403   :  { %v4486_v48 = vpop.f32.mrf.mxu0 }
 0x404   :  { %v3889_v51 = vadd.f32 %v4485_v47, %v4444_v12 }
 0x405   :  { %v4487_v49 = vpop.f32.mrf.mxu0 }
 0x406   :  { %v3894_v52 = vmax.f32 %v3889_v51, 0.0 }
 0x408   :  { %v3895_v53 = vpack.c.bf16 %v3894_v52, %v3894_v52 }
 0x40a   :  { %4503 = vmatmul.mubr.msk.bf16.vlgmr.msra.gmra.mxu1 %vm3935_vm3, %v3895_v53 }
 0x4ca   :  { %v3973_v57 = vpop.f32.mrf.mxu1 }
 0x4cb   :  { %v3974_v58 = vadd.f32 %v4461_v56, %v3973_v57 }
 0x4cc   :  { %v4504_v60 = vpop.f32.mrf.mxu1 }
 0x4cd   :  { %3979 = vst [vmem:[#allocation8] sm:$0x3] %v3974_v58 }
 0x4ce   :  { %v3976_v61 = vpop.f32.mrf.mxu1 }
 0x4cf   :  { %5285 = shalt.err (!%p5282_p5)
}
 0x4d0   :  { %3989 = dma.vmem_to_hbm [thread:$0]  %s3987_s23, 32, %s5651_s11, [#allocation4]   ;;  %v4505_v8 = vpop.f32.mrf.mxu1 }
 0x4d1   :  { %5298 = dma.done.wait [#allocation4], 32  }
 0x4d2   :  { %5299 = vsyncadd [#allocation4], 4294967264 }
 0x4d3   :  { %3993 = vsyncpa [#allocation3], 1 }
 0x4d4   :  { %3994 = vsyncpa [#allocation6], 1 }
 0x4d5   :  { %3995 = vsyncpa [#allocation4], 1 }

</bundles_post_ra>
